<compile_context>
chip_gen: v6e
topology: v6e:2x2x1
jax: 0.10.0
libtpu: 0.0.40
codegen_flags: <defaults>
</compile_context>

<pallas_src>
import jax
import jax.numpy as jnp
from jax.experimental import pallas as pl
from jax.experimental.pallas import tpu as pltpu


# ------------------------------ fused kernel --------------------------------
def _bilstm_tagger_kernel(x_ref, wi_ref, b_ref, wh_ref, fcw_ref, fcb_ref,
                          o_ref, lstm_ref):
    T = x_ref.shape[0]
    H = wh_ref.shape[0] // 2          # hidden size per direction

    # Hoisted input projection: all timesteps, both directions, biases folded.
    # (T, E) @ (E, 8H) -> (T, 8H); cols [0:4H] = forward gates (i, f, g, o),
    # cols [4H:8H] = backward gates (PyTorch gate order).
    xi = jnp.dot(x_ref[...], wi_ref[...],
                 preferred_element_type=jnp.float32) + b_ref[...]
    wh = wh_ref[...]                  # (2H, 8H) block-diag [[Wh_f, 0], [0, Wh_b]]

    def lstm_cell(pre, c):
        # pre: (1, 4H) gate pre-activations in PyTorch order (i, f, g, o).
        i = jax.nn.sigmoid(pre[:, 0 * H:1 * H])
        f = jax.nn.sigmoid(pre[:, 1 * H:2 * H])
        g = jnp.tanh(pre[:, 2 * H:3 * H])
        o = jax.nn.sigmoid(pre[:, 3 * H:4 * H])
        c_new = f * c + i * g
        h_new = o * jnp.tanh(c_new)
        return h_new, c_new

    h = jnp.zeros((1, 2 * H), jnp.float32)        # [h_fwd | h_bwd]
    c_f = jnp.zeros((1, H), jnp.float32)
    c_b = jnp.zeros((1, H), jnp.float32)

    # Fully-unrolled serial recurrence (T static & small). Step t advances the
    # forward direction on x[t] and the backward direction on x[T-1-t]; both
    # hidden states share a single block-diagonal matmul per step.
    for t in range(T):
        hh = jnp.dot(h, wh, preferred_element_type=jnp.float32)       # (1, 8H)
        h_f, c_f = lstm_cell(xi[t:t + 1, 0:4 * H] + hh[:, 0:4 * H], c_f)
        h_b, c_b = lstm_cell(xi[T - 1 - t:T - t, 4 * H:8 * H]
                             + hh[:, 4 * H:8 * H], c_b)
        lstm_ref[t:t + 1, 0:H] = h_f
        lstm_ref[T - 1 - t:T - t, H:2 * H] = h_b
        h = jnp.concatenate([h_f, h_b], axis=1)

    # Fused head: ReLU -> (dropout: identity at eval) -> Linear -> log_softmax(dim=1)
    # TODO(synk): nn.Dropout(drp) is train-time only; eval semantics used here.
    act = jnp.maximum(lstm_ref[...], 0.0)                              # (T, 2H)
    logits = jnp.dot(act, fcw_ref[...],
                     preferred_element_type=jnp.float32) + fcb_ref[...]  # (T, C)
    m = jnp.max(logits, axis=1, keepdims=True)
    e = jnp.exp(logits - m)
    # C=8 < 128 lanes -> one small masked store; padding C to 128 would cost
    # more in an extra wrapper slice than the masked store does at this size.
    o_ref[...] = logits - m - jnp.log(jnp.sum(e, axis=1, keepdims=True))


def bilstm_tagger_forward(sentence_te, params):
    T, _ = sentence_te.shape
    H2, C = params["fc_w"].shape                  # (2H, C)
    return pl.pallas_call(
        _bilstm_tagger_kernel,
        out_shape=jax.ShapeDtypeStruct((T, C), jnp.float32),
        # No grid: single invocation, every operand mapped whole into VMEM.
        scratch_shapes=[pltpu.VMEM((T, H2), jnp.float32)],
    )(sentence_te, params["wi"], params["b"], params["wh"],
      params["fc_w"], params["fc_b"])


# ------------------------------- parameters ---------------------------------
def init_params(key, embedding_dim, hidden_dim, target_size, n_layers=2):
    # NOTE: the PyTorch module accepts n_layers but never passes it to
    # nn.LSTM, so the LSTM is a single bidirectional layer; mirrored here.
    del n_layers
    H = hidden_dim
    k = 1.0 / float(H) ** 0.5
    kf = 1.0 / float(2 * H) ** 0.5

    def u(kk, shape, bound):
        return jax.random.uniform(kk, shape, jnp.float32, -bound, bound)

    ks = jax.random.split(key, 10)
    raw = dict(
        w_ih_f=u(ks[0], (4 * H, embedding_dim), k),   # PyTorch layout (4H, E)
        w_hh_f=u(ks[1], (4 * H, H), k),
        b_ih_f=u(ks[2], (4 * H,), k),
        b_hh_f=u(ks[3], (4 * H,), k),
        w_ih_b=u(ks[4], (4 * H, embedding_dim), k),
        w_hh_b=u(ks[5], (4 * H, H), k),
        b_ih_b=u(ks[6], (4 * H,), k),
        b_hh_b=u(ks[7], (4 * H,), k),
        fc_w=u(ks[8], (target_size, 2 * H), kf),
        fc_b=u(ks[9], (target_size,), kf),
    )

    # Kernel-friendly packing.
    wi = jnp.concatenate([raw["w_ih_f"].T, raw["w_ih_b"].T], axis=1)   # (E, 8H)
    b = jnp.concatenate([raw["b_ih_f"] + raw["b_hh_f"],
                         raw["b_ih_b"] + raw["b_hh_b"]]).reshape(1, 8 * H)
    wh = jnp.zeros((2 * H, 8 * H), jnp.float32)                        # block-diag
    wh = wh.at[0:H, 0:4 * H].set(raw["w_hh_f"].T)
    wh = wh.at[H:2 * H, 4 * H:8 * H].set(raw["w_hh_b"].T)
    return dict(raw=raw, wi=wi, b=b, wh=wh,
                fc_w=raw["fc_w"].T, fc_b=raw["fc_b"].reshape(1, target_size))


# ---------------------------- pure-JAX reference -----------------------------
def bilstm_tagger_reference(sentence_te, params):
    r = params["raw"]
    H = r["w_hh_f"].shape[1]

    def run_direction(xs, w_ih, w_hh, b_ih, b_hh):
        def step(carry, xt):
            h, c = carry
            g = w_ih @ xt + b_ih + w_hh @ h + b_hh
            i = jax.nn.sigmoid(g[0:H])
            f = jax.nn.sigmoid(g[H:2 * H])
            gg = jnp.tanh(g[2 * H:3 * H])
            o = jax.nn.sigmoid(g[3 * H:4 * H])
            c = f * c + i * gg
            h = o * jnp.tanh(c)
            return (h, c), h
        init = (jnp.zeros((H,), jnp.float32), jnp.zeros((H,), jnp.float32))
        _, hs = jax.lax.scan(step, init, xs)
        return hs

    h_f = run_direction(sentence_te, r["w_ih_f"], r["w_hh_f"],
                        r["b_ih_f"], r["b_hh_f"])
    h_b = run_direction(sentence_te[::-1], r["w_ih_b"], r["w_hh_b"],
                        r["b_ih_b"], r["b_hh_b"])[::-1]
    lstm_out = jnp.concatenate([h_f, h_b], axis=1)        # (T, 2H)
    act = jnp.maximum(lstm_out, 0.0)                      # dropout: identity (eval)
    logits = act @ r["fc_w"].T + r["fc_b"]
    return jax.nn.log_softmax(logits, axis=1)


# ----------------------------------- main ------------------------------------
if __name__ == "__main__":
    embedding_dim, hidden_dim, target_size = 16, 32, 8
    n_layers = 2                      # accepted like the PyTorch module; unused
    T = 8

    key = jax.random.PRNGKey(0)
    pkey, xkey = jax.random.split(key)
    params = init_params(pkey, embedding_dim, hidden_dim, target_size, n_layers)
    sentence = jax.random.normal(xkey, (T, embedding_dim), jnp.float32)

    out = jax.block_until_ready(bilstm_tagger_forward(sentence, params))
    ref = jax.block_until_ready(bilstm_tagger_reference(sentence, params))

    assert out.shape == (T, target_size)
    assert bool(jnp.all(jnp.isfinite(out)))
    # log_softmax over dim=1 (the tag axis): exp must normalize along it
    assert bool(jnp.allclose(jnp.sum(jnp.exp(out), axis=1), 1.0, atol=1e-3))
    assert bool(jnp.allclose(out, ref, atol=1e-2, rtol=1e-2))
    print("KERNEL_OK")
</pallas_src>

<mosaic_0001>
module attributes {stable_mosaic.version = 11 : i64} {
  func.func @_bilstm_tagger_kernel(%arg0: memref<8x16xf32, #tpu.memory_space<vmem>>, %arg1: memref<16x256xf32, #tpu.memory_space<vmem>>, %arg2: memref<1x256xf32, #tpu.memory_space<vmem>>, %arg3: memref<64x256xf32, #tpu.memory_space<vmem>>, %arg4: memref<64x8xf32, #tpu.memory_space<vmem>>, %arg5: memref<1x8xf32, #tpu.memory_space<vmem>>, %arg6: memref<8x8xf32, #tpu.memory_space<vmem>>, %arg7: memref<8x64xf32, #tpu.memory_space<vmem>>) attributes {dimension_semantics = [], scalar_prefetch = 0 : i64, scratch_operands = 1 : i64, tpu.core_type = #tpu.core_type<tc>} {
    %c0 = arith.constant 0 : index
    %c0_0 = arith.constant 0 : index
    %0 = vector.load %arg0[%c0, %c0_0] : memref<8x16xf32, #tpu.memory_space<vmem>>, vector<8x16xf32>
    %c0_1 = arith.constant 0 : index
    %c0_2 = arith.constant 0 : index
    %1 = vector.load %arg1[%c0_1, %c0_2] : memref<16x256xf32, #tpu.memory_space<vmem>>, vector<16x256xf32>
    %cst = arith.constant dense<0.000000e+00> : vector<8x256xf32>
    %2 = tpu.matmul %0, %1, %cst {dimension_numbers = #tpu.dot_dimension_numbers<[1], [0], [0], [1], [0, 0, 1, 1], [], []>} : vector<8x16xf32>, vector<16x256xf32>, vector<8x256xf32> -> vector<8x256xf32>
    %c0_3 = arith.constant 0 : index
    %c0_4 = arith.constant 0 : index
    %3 = vector.load %arg2[%c0_3, %c0_4] : memref<1x256xf32, #tpu.memory_space<vmem>>, vector<1x256xf32>
    %4 = vector.broadcast %3 : vector<1x256xf32> to vector<8x256xf32>
    %5 = arith.addf %2, %4 : vector<8x256xf32>
    %c0_5 = arith.constant 0 : index
    %c0_6 = arith.constant 0 : index
    %6 = vector.load %arg3[%c0_5, %c0_6] : memref<64x256xf32, #tpu.memory_space<vmem>>, vector<64x256xf32>
    %cst_7 = arith.constant 0.000000e+00 : f32
    %7 = vector.broadcast %cst_7 : f32 to vector<1x64xf32>
    %cst_8 = arith.constant 0.000000e+00 : f32
    %8 = vector.broadcast %cst_8 : f32 to vector<1x32xf32>
    %cst_9 = arith.constant 0.000000e+00 : f32
    %9 = vector.broadcast %cst_9 : f32 to vector<1x32xf32>
    %cst_10 = arith.constant dense<0.000000e+00> : vector<1x256xf32>
    %10 = tpu.matmul %7, %6, %cst_10 {dimension_numbers = #tpu.dot_dimension_numbers<[1], [0], [0], [1], [0, 0, 1, 1], [], []>} : vector<1x64xf32>, vector<64x256xf32>, vector<1x256xf32> -> vector<1x256xf32>
    %11 = vector.extract_strided_slice %5 {offsets = [0, 0], sizes = [1, 128], strides = [1, 1]} : vector<8x256xf32> to vector<1x128xf32>
    %12 = vector.extract_strided_slice %10 {offsets = [0, 0], sizes = [1, 128], strides = [1, 1]} : vector<1x256xf32> to vector<1x128xf32>
    %13 = arith.addf %11, %12 : vector<1x128xf32>
    %14 = vector.extract_strided_slice %13 {offsets = [0, 0], sizes = [1, 32], strides = [1, 1]} : vector<1x128xf32> to vector<1x32xf32>
    %15 = arith.negf %14 : vector<1x32xf32>
    %16 = math.exp %15 : vector<1x32xf32>
    %cst_11 = arith.constant 1.000000e+00 : f32
    %17 = vector.broadcast %cst_11 : f32 to vector<1x32xf32>
    %18 = arith.addf %17, %16 : vector<1x32xf32>
    %19 = arith.divf %17, %18 : vector<1x32xf32>
    %20 = vector.extract_strided_slice %13 {offsets = [0, 32], sizes = [1, 32], strides = [1, 1]} : vector<1x128xf32> to vector<1x32xf32>
    %21 = arith.negf %20 : vector<1x32xf32>
    %22 = math.exp %21 : vector<1x32xf32>
    %cst_12 = arith.constant 1.000000e+00 : f32
    %23 = vector.broadcast %cst_12 : f32 to vector<1x32xf32>
    %24 = arith.addf %23, %22 : vector<1x32xf32>
    %25 = arith.divf %23, %24 : vector<1x32xf32>
    %26 = vector.extract_strided_slice %13 {offsets = [0, 64], sizes = [1, 32], strides = [1, 1]} : vector<1x128xf32> to vector<1x32xf32>
    %27 = math.tanh %26 : vector<1x32xf32>
    %28 = vector.extract_strided_slice %13 {offsets = [0, 96], sizes = [1, 32], strides = [1, 1]} : vector<1x128xf32> to vector<1x32xf32>
    %29 = arith.negf %28 : vector<1x32xf32>
    %30 = math.exp %29 : vector<1x32xf32>
    %cst_13 = arith.constant 1.000000e+00 : f32
    %31 = vector.broadcast %cst_13 : f32 to vector<1x32xf32>
    %32 = arith.addf %31, %30 : vector<1x32xf32>
    %33 = arith.divf %31, %32 : vector<1x32xf32>
    %34 = arith.mulf %25, %8 : vector<1x32xf32>
    %35 = arith.mulf %19, %27 : vector<1x32xf32>
    %36 = arith.addf %34, %35 : vector<1x32xf32>
    %37 = math.tanh %36 : vector<1x32xf32>
    %38 = arith.mulf %33, %37 : vector<1x32xf32>
    %39 = vector.extract_strided_slice %5 {offsets = [7, 128], sizes = [1, 128], strides = [1, 1]} : vector<8x256xf32> to vector<1x128xf32>
    %40 = vector.extract_strided_slice %10 {offsets = [0, 128], sizes = [1, 128], strides = [1, 1]} : vector<1x256xf32> to vector<1x128xf32>
    %41 = arith.addf %39, %40 : vector<1x128xf32>
    %42 = vector.extract_strided_slice %41 {offsets = [0, 0], sizes = [1, 32], strides = [1, 1]} : vector<1x128xf32> to vector<1x32xf32>
    %43 = arith.negf %42 : vector<1x32xf32>
    %44 = math.exp %43 : vector<1x32xf32>
    %cst_14 = arith.constant 1.000000e+00 : f32
    %45 = vector.broadcast %cst_14 : f32 to vector<1x32xf32>
    %46 = arith.addf %45, %44 : vector<1x32xf32>
    %47 = arith.divf %45, %46 : vector<1x32xf32>
    %48 = vector.extract_strided_slice %41 {offsets = [0, 32], sizes = [1, 32], strides = [1, 1]} : vector<1x128xf32> to vector<1x32xf32>
    %49 = arith.negf %48 : vector<1x32xf32>
    %50 = math.exp %49 : vector<1x32xf32>
    %cst_15 = arith.constant 1.000000e+00 : f32
    %51 = vector.broadcast %cst_15 : f32 to vector<1x32xf32>
    %52 = arith.addf %51, %50 : vector<1x32xf32>
    %53 = arith.divf %51, %52 : vector<1x32xf32>
    %54 = vector.extract_strided_slice %41 {offsets = [0, 64], sizes = [1, 32], strides = [1, 1]} : vector<1x128xf32> to vector<1x32xf32>
    %55 = math.tanh %54 : vector<1x32xf32>
    %56 = vector.extract_strided_slice %41 {offsets = [0, 96], sizes = [1, 32], strides = [1, 1]} : vector<1x128xf32> to vector<1x32xf32>
    %57 = arith.negf %56 : vector<1x32xf32>
    %58 = math.exp %57 : vector<1x32xf32>
    %cst_16 = arith.constant 1.000000e+00 : f32
    %59 = vector.broadcast %cst_16 : f32 to vector<1x32xf32>
    %60 = arith.addf %59, %58 : vector<1x32xf32>
    %61 = arith.divf %59, %60 : vector<1x32xf32>
    %62 = arith.mulf %53, %9 : vector<1x32xf32>
    %63 = arith.mulf %47, %55 : vector<1x32xf32>
    %64 = arith.addf %62, %63 : vector<1x32xf32>
    %65 = math.tanh %64 : vector<1x32xf32>
    %66 = arith.mulf %61, %65 : vector<1x32xf32>
    %c0_17 = arith.constant 0 : index
    %c0_18 = arith.constant 0 : index
    %67 = vector.load %arg7[%c0_17, %c0_18] : memref<8x64xf32, #tpu.memory_space<vmem>>, vector<1x32xf32>
    tpu.vector_store %arg7[%c0_17, %c0_18], %38 {strides = array<i32>} : memref<8x64xf32, #tpu.memory_space<vmem>>, vector<1x32xf32>,
    %c7 = arith.constant 7 : index
    %c32 = arith.constant 32 : index
    %68 = vector.load %arg7[%c7, %c32] : memref<8x64xf32, #tpu.memory_space<vmem>>, vector<1x32xf32>
    tpu.vector_store %arg7[%c7, %c32], %66 {strides = array<i32>} : memref<8x64xf32, #tpu.memory_space<vmem>>, vector<1x32xf32>,
    %69 = tpu.concatenate %38, %66 in 1 : vector<1x32xf32>, vector<1x32xf32> -> vector<1x64xf32>
    %cst_19 = arith.constant dense<0.000000e+00> : vector<1x256xf32>
    %70 = tpu.matmul %69, %6, %cst_19 {dimension_numbers = #tpu.dot_dimension_numbers<[1], [0], [0], [1], [0, 0, 1, 1], [], []>} : vector<1x64xf32>, vector<64x256xf32>, vector<1x256xf32> -> vector<1x256xf32>
    %71 = vector.extract_strided_slice %5 {offsets = [1, 0], sizes = [1, 128], strides = [1, 1]} : vector<8x256xf32> to vector<1x128xf32>
    %72 = vector.extract_strided_slice %70 {offsets = [0, 0], sizes = [1, 128], strides = [1, 1]} : vector<1x256xf32> to vector<1x128xf32>
    %73 = arith.addf %71, %72 : vector<1x128xf32>
    %74 = vector.extract_strided_slice %73 {offsets = [0, 0], sizes = [1, 32], strides = [1, 1]} : vector<1x128xf32> to vector<1x32xf32>
    %75 = arith.negf %74 : vector<1x32xf32>
    %76 = math.exp %75 : vector<1x32xf32>
    %cst_20 = arith.constant 1.000000e+00 : f32
    %77 = vector.broadcast %cst_20 : f32 to vector<1x32xf32>
    %78 = arith.addf %77, %76 : vector<1x32xf32>
    %79 = arith.divf %77, %78 : vector<1x32xf32>
    %80 = vector.extract_strided_slice %73 {offsets = [0, 32], sizes = [1, 32], strides = [1, 1]} : vector<1x128xf32> to vector<1x32xf32>
    %81 = arith.negf %80 : vector<1x32xf32>
    %82 = math.exp %81 : vector<1x32xf32>
    %cst_21 = arith.constant 1.000000e+00 : f32
    %83 = vector.broadcast %cst_21 : f32 to vector<1x32xf32>
    %84 = arith.addf %83, %82 : vector<1x32xf32>
    %85 = arith.divf %83, %84 : vector<1x32xf32>
    %86 = vector.extract_strided_slice %73 {offsets = [0, 64], sizes = [1, 32], strides = [1, 1]} : vector<1x128xf32> to vector<1x32xf32>
    %87 = math.tanh %86 : vector<1x32xf32>
    %88 = vector.extract_strided_slice %73 {offsets = [0, 96], sizes = [1, 32], strides = [1, 1]} : vector<1x128xf32> to vector<1x32xf32>
    %89 = arith.negf %88 : vector<1x32xf32>
    %90 = math.exp %89 : vector<1x32xf32>
    %cst_22 = arith.constant 1.000000e+00 : f32
    %91 = vector.broadcast %cst_22 : f32 to vector<1x32xf32>
    %92 = arith.addf %91, %90 : vector<1x32xf32>
    %93 = arith.divf %91, %92 : vector<1x32xf32>
    %94 = arith.mulf %85, %36 : vector<1x32xf32>
    %95 = arith.mulf %79, %87 : vector<1x32xf32>
    %96 = arith.addf %94, %95 : vector<1x32xf32>
    %97 = math.tanh %96 : vector<1x32xf32>
    %98 = arith.mulf %93, %97 : vector<1x32xf32>
    %99 = vector.extract_strided_slice %5 {offsets = [6, 128], sizes = [1, 128], strides = [1, 1]} : vector<8x256xf32> to vector<1x128xf32>
    %100 = vector.extract_strided_slice %70 {offsets = [0, 128], sizes = [1, 128], strides = [1, 1]} : vector<1x256xf32> to vector<1x128xf32>
    %101 = arith.addf %99, %100 : vector<1x128xf32>
    %102 = vector.extract_strided_slice %101 {offsets = [0, 0], sizes = [1, 32], strides = [1, 1]} : vector<1x128xf32> to vector<1x32xf32>
    %103 = arith.negf %102 : vector<1x32xf32>
    %104 = math.exp %103 : vector<1x32xf32>
    %cst_23 = arith.constant 1.000000e+00 : f32
    %105 = vector.broadcast %cst_23 : f32 to vector<1x32xf32>
    %106 = arith.addf %105, %104 : vector<1x32xf32>
    %107 = arith.divf %105, %106 : vector<1x32xf32>
    %108 = vector.extract_strided_slice %101 {offsets = [0, 32], sizes = [1, 32], strides = [1, 1]} : vector<1x128xf32> to vector<1x32xf32>
    %109 = arith.negf %108 : vector<1x32xf32>
    %110 = math.exp %109 : vector<1x32xf32>
    %cst_24 = arith.constant 1.000000e+00 : f32
    %111 = vector.broadcast %cst_24 : f32 to vector<1x32xf32>
    %112 = arith.addf %111, %110 : vector<1x32xf32>
    %113 = arith.divf %111, %112 : vector<1x32xf32>
    %114 = vector.extract_strided_slice %101 {offsets = [0, 64], sizes = [1, 32], strides = [1, 1]} : vector<1x128xf32> to vector<1x32xf32>
    %115 = math.tanh %114 : vector<1x32xf32>
    %116 = vector.extract_strided_slice %101 {offsets = [0, 96], sizes = [1, 32], strides = [1, 1]} : vector<1x128xf32> to vector<1x32xf32>
    %117 = arith.negf %116 : vector<1x32xf32>
    %118 = math.exp %117 : vector<1x32xf32>
    %cst_25 = arith.constant 1.000000e+00 : f32
    %119 = vector.broadcast %cst_25 : f32 to vector<1x32xf32>
    %120 = arith.addf %119, %118 : vector<1x32xf32>
    %121 = arith.divf %119, %120 : vector<1x32xf32>
    %122 = arith.mulf %113, %64 : vector<1x32xf32>
    %123 = arith.mulf %107, %115 : vector<1x32xf32>
    %124 = arith.addf %122, %123 : vector<1x32xf32>
    %125 = math.tanh %124 : vector<1x32xf32>
    %126 = arith.mulf %121, %125 : vector<1x32xf32>
    %c1 = arith.constant 1 : index
    %c0_26 = arith.constant 0 : index
    %127 = vector.load %arg7[%c1, %c0_26] : memref<8x64xf32, #tpu.memory_space<vmem>>, vector<1x32xf32>
    tpu.vector_store %arg7[%c1, %c0_26], %98 {strides = array<i32>} : memref<8x64xf32, #tpu.memory_space<vmem>>, vector<1x32xf32>,
    %c6 = arith.constant 6 : index
    %c32_27 = arith.constant 32 : index
    %128 = vector.load %arg7[%c6, %c32_27] : memref<8x64xf32, #tpu.memory_space<vmem>>, vector<1x32xf32>
    tpu.vector_store %arg7[%c6, %c32_27], %126 {strides = array<i32>} : memref<8x64xf32, #tpu.memory_space<vmem>>, vector<1x32xf32>,
    %129 = tpu.concatenate %98, %126 in 1 : vector<1x32xf32>, vector<1x32xf32> -> vector<1x64xf32>
    %cst_28 = arith.constant dense<0.000000e+00> : vector<1x256xf32>
    %130 = tpu.matmul %129, %6, %cst_28 {dimension_numbers = #tpu.dot_dimension_numbers<[1], [0], [0], [1], [0, 0, 1, 1], [], []>} : vector<1x64xf32>, vector<64x256xf32>, vector<1x256xf32> -> vector<1x256xf32>
    %131 = vector.extract_strided_slice %5 {offsets = [2, 0], sizes = [1, 128], strides = [1, 1]} : vector<8x256xf32> to vector<1x128xf32>
    %132 = vector.extract_strided_slice %130 {offsets = [0, 0], sizes = [1, 128], strides = [1, 1]} : vector<1x256xf32> to vector<1x128xf32>
    %133 = arith.addf %131, %132 : vector<1x128xf32>
    %134 = vector.extract_strided_slice %133 {offsets = [0, 0], sizes = [1, 32], strides = [1, 1]} : vector<1x128xf32> to vector<1x32xf32>
    %135 = arith.negf %134 : vector<1x32xf32>
    %136 = math.exp %135 : vector<1x32xf32>
    %cst_29 = arith.constant 1.000000e+00 : f32
    %137 = vector.broadcast %cst_29 : f32 to vector<1x32xf32>
    %138 = arith.addf %137, %136 : vector<1x32xf32>
    %139 = arith.divf %137, %138 : vector<1x32xf32>
    %140 = vector.extract_strided_slice %133 {offsets = [0, 32], sizes = [1, 32], strides = [1, 1]} : vector<1x128xf32> to vector<1x32xf32>
    %141 = arith.negf %140 : vector<1x32xf32>
    %142 = math.exp %141 : vector<1x32xf32>
    %cst_30 = arith.constant 1.000000e+00 : f32
    %143 = vector.broadcast %cst_30 : f32 to vector<1x32xf32>
    %144 = arith.addf %143, %142 : vector<1x32xf32>
    %145 = arith.divf %143, %144 : vector<1x32xf32>
    %146 = vector.extract_strided_slice %133 {offsets = [0, 64], sizes = [1, 32], strides = [1, 1]} : vector<1x128xf32> to vector<1x32xf32>
    %147 = math.tanh %146 : vector<1x32xf32>
    %148 = vector.extract_strided_slice %133 {offsets = [0, 96], sizes = [1, 32], strides = [1, 1]} : vector<1x128xf32> to vector<1x32xf32>
    %149 = arith.negf %148 : vector<1x32xf32>
    %150 = math.exp %149 : vector<1x32xf32>
    %cst_31 = arith.constant 1.000000e+00 : f32
    %151 = vector.broadcast %cst_31 : f32 to vector<1x32xf32>
    %152 = arith.addf %151, %150 : vector<1x32xf32>
    %153 = arith.divf %151, %152 : vector<1x32xf32>
    %154 = arith.mulf %145, %96 : vector<1x32xf32>
    %155 = arith.mulf %139, %147 : vector<1x32xf32>
    %156 = arith.addf %154, %155 : vector<1x32xf32>
    %157 = math.tanh %156 : vector<1x32xf32>
    %158 = arith.mulf %153, %157 : vector<1x32xf32>
    %159 = vector.extract_strided_slice %5 {offsets = [5, 128], sizes = [1, 128], strides = [1, 1]} : vector<8x256xf32> to vector<1x128xf32>
    %160 = vector.extract_strided_slice %130 {offsets = [0, 128], sizes = [1, 128], strides = [1, 1]} : vector<1x256xf32> to vector<1x128xf32>
    %161 = arith.addf %159, %160 : vector<1x128xf32>
    %162 = vector.extract_strided_slice %161 {offsets = [0, 0], sizes = [1, 32], strides = [1, 1]} : vector<1x128xf32> to vector<1x32xf32>
    %163 = arith.negf %162 : vector<1x32xf32>
    %164 = math.exp %163 : vector<1x32xf32>
    %cst_32 = arith.constant 1.000000e+00 : f32
    %165 = vector.broadcast %cst_32 : f32 to vector<1x32xf32>
    %166 = arith.addf %165, %164 : vector<1x32xf32>
    %167 = arith.divf %165, %166 : vector<1x32xf32>
    %168 = vector.extract_strided_slice %161 {offsets = [0, 32], sizes = [1, 32], strides = [1, 1]} : vector<1x128xf32> to vector<1x32xf32>
    %169 = arith.negf %168 : vector<1x32xf32>
    %170 = math.exp %169 : vector<1x32xf32>
    %cst_33 = arith.constant 1.000000e+00 : f32
    %171 = vector.broadcast %cst_33 : f32 to vector<1x32xf32>
    %172 = arith.addf %171, %170 : vector<1x32xf32>
    %173 = arith.divf %171, %172 : vector<1x32xf32>
    %174 = vector.extract_strided_slice %161 {offsets = [0, 64], sizes = [1, 32], strides = [1, 1]} : vector<1x128xf32> to vector<1x32xf32>
    %175 = math.tanh %174 : vector<1x32xf32>
    %176 = vector.extract_strided_slice %161 {offsets = [0, 96], sizes = [1, 32], strides = [1, 1]} : vector<1x128xf32> to vector<1x32xf32>
    %177 = arith.negf %176 : vector<1x32xf32>
    %178 = math.exp %177 : vector<1x32xf32>
    %cst_34 = arith.constant 1.000000e+00 : f32
    %179 = vector.broadcast %cst_34 : f32 to vector<1x32xf32>
    %180 = arith.addf %179, %178 : vector<1x32xf32>
    %181 = arith.divf %179, %180 : vector<1x32xf32>
    %182 = arith.mulf %173, %124 : vector<1x32xf32>
    %183 = arith.mulf %167, %175 : vector<1x32xf32>
    %184 = arith.addf %182, %183 : vector<1x32xf32>
    %185 = math.tanh %184 : vector<1x32xf32>
    %186 = arith.mulf %181, %185 : vector<1x32xf32>
    %c2 = arith.constant 2 : index
    %c0_35 = arith.constant 0 : index
    %187 = vector.load %arg7[%c2, %c0_35] : memref<8x64xf32, #tpu.memory_space<vmem>>, vector<1x32xf32>
    tpu.vector_store %arg7[%c2, %c0_35], %158 {strides = array<i32>} : memref<8x64xf32, #tpu.memory_space<vmem>>, vector<1x32xf32>,
    %c5 = arith.constant 5 : index
    %c32_36 = arith.constant 32 : index
    %188 = vector.load %arg7[%c5, %c32_36] : memref<8x64xf32, #tpu.memory_space<vmem>>, vector<1x32xf32>
    tpu.vector_store %arg7[%c5, %c32_36], %186 {strides = array<i32>} : memref<8x64xf32, #tpu.memory_space<vmem>>, vector<1x32xf32>,
    %189 = tpu.concatenate %158, %186 in 1 : vector<1x32xf32>, vector<1x32xf32> -> vector<1x64xf32>
    %cst_37 = arith.constant dense<0.000000e+00> : vector<1x256xf32>
    %190 = tpu.matmul %189, %6, %cst_37 {dimension_numbers = #tpu.dot_dimension_numbers<[1], [0], [0], [1], [0, 0, 1, 1], [], []>} : vector<1x64xf32>, vector<64x256xf32>, vector<1x256xf32> -> vector<1x256xf32>
    %191 = vector.extract_strided_slice %5 {offsets = [3, 0], sizes = [1, 128], strides = [1, 1]} : vector<8x256xf32> to vector<1x128xf32>
    %192 = vector.extract_strided_slice %190 {offsets = [0, 0], sizes = [1, 128], strides = [1, 1]} : vector<1x256xf32> to vector<1x128xf32>
    %193 = arith.addf %191, %192 : vector<1x128xf32>
    %194 = vector.extract_strided_slice %193 {offsets = [0, 0], sizes = [1, 32], strides = [1, 1]} : vector<1x128xf32> to vector<1x32xf32>
    %195 = arith.negf %194 : vector<1x32xf32>
    %196 = math.exp %195 : vector<1x32xf32>
    %cst_38 = arith.constant 1.000000e+00 : f32
    %197 = vector.broadcast %cst_38 : f32 to vector<1x32xf32>
    %198 = arith.addf %197, %196 : vector<1x32xf32>
    %199 = arith.divf %197, %198 : vector<1x32xf32>
    %200 = vector.extract_strided_slice %193 {offsets = [0, 32], sizes = [1, 32], strides = [1, 1]} : vector<1x128xf32> to vector<1x32xf32>
    %201 = arith.negf %200 : vector<1x32xf32>
    %202 = math.exp %201 : vector<1x32xf32>
    %cst_39 = arith.constant 1.000000e+00 : f32
    %203 = vector.broadcast %cst_39 : f32 to vector<1x32xf32>
    %204 = arith.addf %203, %202 : vector<1x32xf32>
    %205 = arith.divf %203, %204 : vector<1x32xf32>
    %206 = vector.extract_strided_slice %193 {offsets = [0, 64], sizes = [1, 32], strides = [1, 1]} : vector<1x128xf32> to vector<1x32xf32>
    %207 = math.tanh %206 : vector<1x32xf32>
    %208 = vector.extract_strided_slice %193 {offsets = [0, 96], sizes = [1, 32], strides = [1, 1]} : vector<1x128xf32> to vector<1x32xf32>
    %209 = arith.negf %208 : vector<1x32xf32>
    %210 = math.exp %209 : vector<1x32xf32>
    %cst_40 = arith.constant 1.000000e+00 : f32
    %211 = vector.broadcast %cst_40 : f32 to vector<1x32xf32>
    %212 = arith.addf %211, %210 : vector<1x32xf32>
    %213 = arith.divf %211, %212 : vector<1x32xf32>
    %214 = arith.mulf %205, %156 : vector<1x32xf32>
    %215 = arith.mulf %199, %207 : vector<1x32xf32>
    %216 = arith.addf %214, %215 : vector<1x32xf32>
    %217 = math.tanh %216 : vector<1x32xf32>
    %218 = arith.mulf %213, %217 : vector<1x32xf32>
    %219 = vector.extract_strided_slice %5 {offsets = [4, 128], sizes = [1, 128], strides = [1, 1]} : vector<8x256xf32> to vector<1x128xf32>
    %220 = vector.extract_strided_slice %190 {offsets = [0, 128], sizes = [1, 128], strides = [1, 1]} : vector<1x256xf32> to vector<1x128xf32>
    %221 = arith.addf %219, %220 : vector<1x128xf32>
    %222 = vector.extract_strided_slice %221 {offsets = [0, 0], sizes = [1, 32], strides = [1, 1]} : vector<1x128xf32> to vector<1x32xf32>
    %223 = arith.negf %222 : vector<1x32xf32>
    %224 = math.exp %223 : vector<1x32xf32>
    %cst_41 = arith.constant 1.000000e+00 : f32
    %225 = vector.broadcast %cst_41 : f32 to vector<1x32xf32>
    %226 = arith.addf %225, %224 : vector<1x32xf32>
    %227 = arith.divf %225, %226 : vector<1x32xf32>
    %228 = vector.extract_strided_slice %221 {offsets = [0, 32], sizes = [1, 32], strides = [1, 1]} : vector<1x128xf32> to vector<1x32xf32>
    %229 = arith.negf %228 : vector<1x32xf32>
    %230 = math.exp %229 : vector<1x32xf32>
    %cst_42 = arith.constant 1.000000e+00 : f32
    %231 = vector.broadcast %cst_42 : f32 to vector<1x32xf32>
    %232 = arith.addf %231, %230 : vector<1x32xf32>
    %233 = arith.divf %231, %232 : vector<1x32xf32>
    %234 = vector.extract_strided_slice %221 {offsets = [0, 64], sizes = [1, 32], strides = [1, 1]} : vector<1x128xf32> to vector<1x32xf32>
    %235 = math.tanh %234 : vector<1x32xf32>
    %236 = vector.extract_strided_slice %221 {offsets = [0, 96], sizes = [1, 32], strides = [1, 1]} : vector<1x128xf32> to vector<1x32xf32>
    %237 = arith.negf %236 : vector<1x32xf32>
    %238 = math.exp %237 : vector<1x32xf32>
    %cst_43 = arith.constant 1.000000e+00 : f32
    %239 = vector.broadcast %cst_43 : f32 to vector<1x32xf32>
    %240 = arith.addf %239, %238 : vector<1x32xf32>
    %241 = arith.divf %239, %240 : vector<1x32xf32>
    %242 = arith.mulf %233, %184 : vector<1x32xf32>
    %243 = arith.mulf %227, %235 : vector<1x32xf32>
    %244 = arith.addf %242, %243 : vector<1x32xf32>
    %245 = math.tanh %244 : vector<1x32xf32>
    %246 = arith.mulf %241, %245 : vector<1x32xf32>
    %c3 = arith.constant 3 : index
    %c0_44 = arith.constant 0 : index
    %247 = vector.load %arg7[%c3, %c0_44] : memref<8x64xf32, #tpu.memory_space<vmem>>, vector<1x32xf32>
    tpu.vector_store %arg7[%c3, %c0_44], %218 {strides = array<i32>} : memref<8x64xf32, #tpu.memory_space<vmem>>, vector<1x32xf32>,
    %c4 = arith.constant 4 : index
    %c32_45 = arith.constant 32 : index
    %248 = vector.load %arg7[%c4, %c32_45] : memref<8x64xf32, #tpu.memory_space<vmem>>, vector<1x32xf32>
    tpu.vector_store %arg7[%c4, %c32_45], %246 {strides = array<i32>} : memref<8x64xf32, #tpu.memory_space<vmem>>, vector<1x32xf32>,
    %249 = tpu.concatenate %218, %246 in 1 : vector<1x32xf32>, vector<1x32xf32> -> vector<1x64xf32>
    %cst_46 = arith.constant dense<0.000000e+00> : vector<1x256xf32>
    %250 = tpu.matmul %249, %6, %cst_46 {dimension_numbers = #tpu.dot_dimension_numbers<[1], [0], [0], [1], [0, 0, 1, 1], [], []>} : vector<1x64xf32>, vector<64x256xf32>, vector<1x256xf32> -> vector<1x256xf32>
    %251 = vector.extract_strided_slice %5 {offsets = [4, 0], sizes = [1, 128], strides = [1, 1]} : vector<8x256xf32> to vector<1x128xf32>
    %252 = vector.extract_strided_slice %250 {offsets = [0, 0], sizes = [1, 128], strides = [1, 1]} : vector<1x256xf32> to vector<1x128xf32>
    %253 = arith.addf %251, %252 : vector<1x128xf32>
    %254 = vector.extract_strided_slice %253 {offsets = [0, 0], sizes = [1, 32], strides = [1, 1]} : vector<1x128xf32> to vector<1x32xf32>
    %255 = arith.negf %254 : vector<1x32xf32>
    %256 = math.exp %255 : vector<1x32xf32>
    %cst_47 = arith.constant 1.000000e+00 : f32
    %257 = vector.broadcast %cst_47 : f32 to vector<1x32xf32>
    %258 = arith.addf %257, %256 : vector<1x32xf32>
    %259 = arith.divf %257, %258 : vector<1x32xf32>
    %260 = vector.extract_strided_slice %253 {offsets = [0, 32], sizes = [1, 32], strides = [1, 1]} : vector<1x128xf32> to vector<1x32xf32>
    %261 = arith.negf %260 : vector<1x32xf32>
    %262 = math.exp %261 : vector<1x32xf32>
    %cst_48 = arith.constant 1.000000e+00 : f32
    %263 = vector.broadcast %cst_48 : f32 to vector<1x32xf32>
    %264 = arith.addf %263, %262 : vector<1x32xf32>
    %265 = arith.divf %263, %264 : vector<1x32xf32>
    %266 = vector.extract_strided_slice %253 {offsets = [0, 64], sizes = [1, 32], strides = [1, 1]} : vector<1x128xf32> to vector<1x32xf32>
    %267 = math.tanh %266 : vector<1x32xf32>
    %268 = vector.extract_strided_slice %253 {offsets = [0, 96], sizes = [1, 32], strides = [1, 1]} : vector<1x128xf32> to vector<1x32xf32>
    %269 = arith.negf %268 : vector<1x32xf32>
    %270 = math.exp %269 : vector<1x32xf32>
    %cst_49 = arith.constant 1.000000e+00 : f32
    %271 = vector.broadcast %cst_49 : f32 to vector<1x32xf32>
    %272 = arith.addf %271, %270 : vector<1x32xf32>
    %273 = arith.divf %271, %272 : vector<1x32xf32>
    %274 = arith.mulf %265, %216 : vector<1x32xf32>
    %275 = arith.mulf %259, %267 : vector<1x32xf32>
    %276 = arith.addf %274, %275 : vector<1x32xf32>
    %277 = math.tanh %276 : vector<1x32xf32>
    %278 = arith.mulf %273, %277 : vector<1x32xf32>
    %279 = vector.extract_strided_slice %5 {offsets = [3, 128], sizes = [1, 128], strides = [1, 1]} : vector<8x256xf32> to vector<1x128xf32>
    %280 = vector.extract_strided_slice %250 {offsets = [0, 128], sizes = [1, 128], strides = [1, 1]} : vector<1x256xf32> to vector<1x128xf32>
    %281 = arith.addf %279, %280 : vector<1x128xf32>
    %282 = vector.extract_strided_slice %281 {offsets = [0, 0], sizes = [1, 32], strides = [1, 1]} : vector<1x128xf32> to vector<1x32xf32>
    %283 = arith.negf %282 : vector<1x32xf32>
    %284 = math.exp %283 : vector<1x32xf32>
    %cst_50 = arith.constant 1.000000e+00 : f32
    %285 = vector.broadcast %cst_50 : f32 to vector<1x32xf32>
    %286 = arith.addf %285, %284 : vector<1x32xf32>
    %287 = arith.divf %285, %286 : vector<1x32xf32>
    %288 = vector.extract_strided_slice %281 {offsets = [0, 32], sizes = [1, 32], strides = [1, 1]} : vector<1x128xf32> to vector<1x32xf32>
    %289 = arith.negf %288 : vector<1x32xf32>
    %290 = math.exp %289 : vector<1x32xf32>
    %cst_51 = arith.constant 1.000000e+00 : f32
    %291 = vector.broadcast %cst_51 : f32 to vector<1x32xf32>
    %292 = arith.addf %291, %290 : vector<1x32xf32>
    %293 = arith.divf %291, %292 : vector<1x32xf32>
    %294 = vector.extract_strided_slice %281 {offsets = [0, 64], sizes = [1, 32], strides = [1, 1]} : vector<1x128xf32> to vector<1x32xf32>
    %295 = math.tanh %294 : vector<1x32xf32>
    %296 = vector.extract_strided_slice %281 {offsets = [0, 96], sizes = [1, 32], strides = [1, 1]} : vector<1x128xf32> to vector<1x32xf32>
    %297 = arith.negf %296 : vector<1x32xf32>
    %298 = math.exp %297 : vector<1x32xf32>
    %cst_52 = arith.constant 1.000000e+00 : f32
    %299 = vector.broadcast %cst_52 : f32 to vector<1x32xf32>
    %300 = arith.addf %299, %298 : vector<1x32xf32>
    %301 = arith.divf %299, %300 : vector<1x32xf32>
    %302 = arith.mulf %293, %244 : vector<1x32xf32>
    %303 = arith.mulf %287, %295 : vector<1x32xf32>
    %304 = arith.addf %302, %303 : vector<1x32xf32>
    %305 = math.tanh %304 : vector<1x32xf32>
    %306 = arith.mulf %301, %305 : vector<1x32xf32>
    %c4_53 = arith.constant 4 : index
    %c0_54 = arith.constant 0 : index
    %307 = vector.load %arg7[%c4_53, %c0_54] : memref<8x64xf32, #tpu.memory_space<vmem>>, vector<1x32xf32>
    tpu.vector_store %arg7[%c4_53, %c0_54], %278 {strides = array<i32>} : memref<8x64xf32, #tpu.memory_space<vmem>>, vector<1x32xf32>,
    %c3_55 = arith.constant 3 : index
    %c32_56 = arith.constant 32 : index
    %308 = vector.load %arg7[%c3_55, %c32_56] : memref<8x64xf32, #tpu.memory_space<vmem>>, vector<1x32xf32>
    tpu.vector_store %arg7[%c3_55, %c32_56], %306 {strides = array<i32>} : memref<8x64xf32, #tpu.memory_space<vmem>>, vector<1x32xf32>,
    %309 = tpu.concatenate %278, %306 in 1 : vector<1x32xf32>, vector<1x32xf32> -> vector<1x64xf32>
    %cst_57 = arith.constant dense<0.000000e+00> : vector<1x256xf32>
    %310 = tpu.matmul %309, %6, %cst_57 {dimension_numbers = #tpu.dot_dimension_numbers<[1], [0], [0], [1], [0, 0, 1, 1], [], []>} : vector<1x64xf32>, vector<64x256xf32>, vector<1x256xf32> -> vector<1x256xf32>
    %311 = vector.extract_strided_slice %5 {offsets = [5, 0], sizes = [1, 128], strides = [1, 1]} : vector<8x256xf32> to vector<1x128xf32>
    %312 = vector.extract_strided_slice %310 {offsets = [0, 0], sizes = [1, 128], strides = [1, 1]} : vector<1x256xf32> to vector<1x128xf32>
    %313 = arith.addf %311, %312 : vector<1x128xf32>
    %314 = vector.extract_strided_slice %313 {offsets = [0, 0], sizes = [1, 32], strides = [1, 1]} : vector<1x128xf32> to vector<1x32xf32>
    %315 = arith.negf %314 : vector<1x32xf32>
    %316 = math.exp %315 : vector<1x32xf32>
    %cst_58 = arith.constant 1.000000e+00 : f32
    %317 = vector.broadcast %cst_58 : f32 to vector<1x32xf32>
    %318 = arith.addf %317, %316 : vector<1x32xf32>
    %319 = arith.divf %317, %318 : vector<1x32xf32>
    %320 = vector.extract_strided_slice %313 {offsets = [0, 32], sizes = [1, 32], strides = [1, 1]} : vector<1x128xf32> to vector<1x32xf32>
    %321 = arith.negf %320 : vector<1x32xf32>
    %322 = math.exp %321 : vector<1x32xf32>
    %cst_59 = arith.constant 1.000000e+00 : f32
    %323 = vector.broadcast %cst_59 : f32 to vector<1x32xf32>
    %324 = arith.addf %323, %322 : vector<1x32xf32>
    %325 = arith.divf %323, %324 : vector<1x32xf32>
    %326 = vector.extract_strided_slice %313 {offsets = [0, 64], sizes = [1, 32], strides = [1, 1]} : vector<1x128xf32> to vector<1x32xf32>
    %327 = math.tanh %326 : vector<1x32xf32>
    %328 = vector.extract_strided_slice %313 {offsets = [0, 96], sizes = [1, 32], strides = [1, 1]} : vector<1x128xf32> to vector<1x32xf32>
    %329 = arith.negf %328 : vector<1x32xf32>
    %330 = math.exp %329 : vector<1x32xf32>
    %cst_60 = arith.constant 1.000000e+00 : f32
    %331 = vector.broadcast %cst_60 : f32 to vector<1x32xf32>
    %332 = arith.addf %331, %330 : vector<1x32xf32>
    %333 = arith.divf %331, %332 : vector<1x32xf32>
    %334 = arith.mulf %325, %276 : vector<1x32xf32>
    %335 = arith.mulf %319, %327 : vector<1x32xf32>
    %336 = arith.addf %334, %335 : vector<1x32xf32>
    %337 = math.tanh %336 : vector<1x32xf32>
    %338 = arith.mulf %333, %337 : vector<1x32xf32>
    %339 = vector.extract_strided_slice %5 {offsets = [2, 128], sizes = [1, 128], strides = [1, 1]} : vector<8x256xf32> to vector<1x128xf32>
    %340 = vector.extract_strided_slice %310 {offsets = [0, 128], sizes = [1, 128], strides = [1, 1]} : vector<1x256xf32> to vector<1x128xf32>
    %341 = arith.addf %339, %340 : vector<1x128xf32>
    %342 = vector.extract_strided_slice %341 {offsets = [0, 0], sizes = [1, 32], strides = [1, 1]} : vector<1x128xf32> to vector<1x32xf32>
    %343 = arith.negf %342 : vector<1x32xf32>
    %344 = math.exp %343 : vector<1x32xf32>
    %cst_61 = arith.constant 1.000000e+00 : f32
    %345 = vector.broadcast %cst_61 : f32 to vector<1x32xf32>
    %346 = arith.addf %345, %344 : vector<1x32xf32>
    %347 = arith.divf %345, %346 : vector<1x32xf32>
    %348 = vector.extract_strided_slice %341 {offsets = [0, 32], sizes = [1, 32], strides = [1, 1]} : vector<1x128xf32> to vector<1x32xf32>
    %349 = arith.negf %348 : vector<1x32xf32>
    %350 = math.exp %349 : vector<1x32xf32>
    %cst_62 = arith.constant 1.000000e+00 : f32
    %351 = vector.broadcast %cst_62 : f32 to vector<1x32xf32>
    %352 = arith.addf %351, %350 : vector<1x32xf32>
    %353 = arith.divf %351, %352 : vector<1x32xf32>
    %354 = vector.extract_strided_slice %341 {offsets = [0, 64], sizes = [1, 32], strides = [1, 1]} : vector<1x128xf32> to vector<1x32xf32>
    %355 = math.tanh %354 : vector<1x32xf32>
    %356 = vector.extract_strided_slice %341 {offsets = [0, 96], sizes = [1, 32], strides = [1, 1]} : vector<1x128xf32> to vector<1x32xf32>
    %357 = arith.negf %356 : vector<1x32xf32>
    %358 = math.exp %357 : vector<1x32xf32>
    %cst_63 = arith.constant 1.000000e+00 : f32
    %359 = vector.broadcast %cst_63 : f32 to vector<1x32xf32>
    %360 = arith.addf %359, %358 : vector<1x32xf32>
    %361 = arith.divf %359, %360 : vector<1x32xf32>
    %362 = arith.mulf %353, %304 : vector<1x32xf32>
    %363 = arith.mulf %347, %355 : vector<1x32xf32>
    %364 = arith.addf %362, %363 : vector<1x32xf32>
    %365 = math.tanh %364 : vector<1x32xf32>
    %366 = arith.mulf %361, %365 : vector<1x32xf32>
    %c5_64 = arith.constant 5 : index
    %c0_65 = arith.constant 0 : index
    %367 = vector.load %arg7[%c5_64, %c0_65] : memref<8x64xf32, #tpu.memory_space<vmem>>, vector<1x32xf32>
    tpu.vector_store %arg7[%c5_64, %c0_65], %338 {strides = array<i32>} : memref<8x64xf32, #tpu.memory_space<vmem>>, vector<1x32xf32>,
    %c2_66 = arith.constant 2 : index
    %c32_67 = arith.constant 32 : index
    %368 = vector.load %arg7[%c2_66, %c32_67] : memref<8x64xf32, #tpu.memory_space<vmem>>, vector<1x32xf32>
    tpu.vector_store %arg7[%c2_66, %c32_67], %366 {strides = array<i32>} : memref<8x64xf32, #tpu.memory_space<vmem>>, vector<1x32xf32>,
    %369 = tpu.concatenate %338, %366 in 1 : vector<1x32xf32>, vector<1x32xf32> -> vector<1x64xf32>
    %cst_68 = arith.constant dense<0.000000e+00> : vector<1x256xf32>
    %370 = tpu.matmul %369, %6, %cst_68 {dimension_numbers = #tpu.dot_dimension_numbers<[1], [0], [0], [1], [0, 0, 1, 1], [], []>} : vector<1x64xf32>, vector<64x256xf32>, vector<1x256xf32> -> vector<1x256xf32>
    %371 = vector.extract_strided_slice %5 {offsets = [6, 0], sizes = [1, 128], strides = [1, 1]} : vector<8x256xf32> to vector<1x128xf32>
    %372 = vector.extract_strided_slice %370 {offsets = [0, 0], sizes = [1, 128], strides = [1, 1]} : vector<1x256xf32> to vector<1x128xf32>
    %373 = arith.addf %371, %372 : vector<1x128xf32>
    %374 = vector.extract_strided_slice %373 {offsets = [0, 0], sizes = [1, 32], strides = [1, 1]} : vector<1x128xf32> to vector<1x32xf32>
    %375 = arith.negf %374 : vector<1x32xf32>
    %376 = math.exp %375 : vector<1x32xf32>
    %cst_69 = arith.constant 1.000000e+00 : f32
    %377 = vector.broadcast %cst_69 : f32 to vector<1x32xf32>
    %378 = arith.addf %377, %376 : vector<1x32xf32>
    %379 = arith.divf %377, %378 : vector<1x32xf32>
    %380 = vector.extract_strided_slice %373 {offsets = [0, 32], sizes = [1, 32], strides = [1, 1]} : vector<1x128xf32> to vector<1x32xf32>
    %381 = arith.negf %380 : vector<1x32xf32>
    %382 = math.exp %381 : vector<1x32xf32>
    %cst_70 = arith.constant 1.000000e+00 : f32
    %383 = vector.broadcast %cst_70 : f32 to vector<1x32xf32>
    %384 = arith.addf %383, %382 : vector<1x32xf32>
    %385 = arith.divf %383, %384 : vector<1x32xf32>
    %386 = vector.extract_strided_slice %373 {offsets = [0, 64], sizes = [1, 32], strides = [1, 1]} : vector<1x128xf32> to vector<1x32xf32>
    %387 = math.tanh %386 : vector<1x32xf32>
    %388 = vector.extract_strided_slice %373 {offsets = [0, 96], sizes = [1, 32], strides = [1, 1]} : vector<1x128xf32> to vector<1x32xf32>
    %389 = arith.negf %388 : vector<1x32xf32>
    %390 = math.exp %389 : vector<1x32xf32>
    %cst_71 = arith.constant 1.000000e+00 : f32
    %391 = vector.broadcast %cst_71 : f32 to vector<1x32xf32>
    %392 = arith.addf %391, %390 : vector<1x32xf32>
    %393 = arith.divf %391, %392 : vector<1x32xf32>
    %394 = arith.mulf %385, %336 : vector<1x32xf32>
    %395 = arith.mulf %379, %387 : vector<1x32xf32>
    %396 = arith.addf %394, %395 : vector<1x32xf32>
    %397 = math.tanh %396 : vector<1x32xf32>
    %398 = arith.mulf %393, %397 : vector<1x32xf32>
    %399 = vector.extract_strided_slice %5 {offsets = [1, 128], sizes = [1, 128], strides = [1, 1]} : vector<8x256xf32> to vector<1x128xf32>
    %400 = vector.extract_strided_slice %370 {offsets = [0, 128], sizes = [1, 128], strides = [1, 1]} : vector<1x256xf32> to vector<1x128xf32>
    %401 = arith.addf %399, %400 : vector<1x128xf32>
    %402 = vector.extract_strided_slice %401 {offsets = [0, 0], sizes = [1, 32], strides = [1, 1]} : vector<1x128xf32> to vector<1x32xf32>
    %403 = arith.negf %402 : vector<1x32xf32>
    %404 = math.exp %403 : vector<1x32xf32>
    %cst_72 = arith.constant 1.000000e+00 : f32
    %405 = vector.broadcast %cst_72 : f32 to vector<1x32xf32>
    %406 = arith.addf %405, %404 : vector<1x32xf32>
    %407 = arith.divf %405, %406 : vector<1x32xf32>
    %408 = vector.extract_strided_slice %401 {offsets = [0, 32], sizes = [1, 32], strides = [1, 1]} : vector<1x128xf32> to vector<1x32xf32>
    %409 = arith.negf %408 : vector<1x32xf32>
    %410 = math.exp %409 : vector<1x32xf32>
    %cst_73 = arith.constant 1.000000e+00 : f32
    %411 = vector.broadcast %cst_73 : f32 to vector<1x32xf32>
    %412 = arith.addf %411, %410 : vector<1x32xf32>
    %413 = arith.divf %411, %412 : vector<1x32xf32>
    %414 = vector.extract_strided_slice %401 {offsets = [0, 64], sizes = [1, 32], strides = [1, 1]} : vector<1x128xf32> to vector<1x32xf32>
    %415 = math.tanh %414 : vector<1x32xf32>
    %416 = vector.extract_strided_slice %401 {offsets = [0, 96], sizes = [1, 32], strides = [1, 1]} : vector<1x128xf32> to vector<1x32xf32>
    %417 = arith.negf %416 : vector<1x32xf32>
    %418 = math.exp %417 : vector<1x32xf32>
    %cst_74 = arith.constant 1.000000e+00 : f32
    %419 = vector.broadcast %cst_74 : f32 to vector<1x32xf32>
    %420 = arith.addf %419, %418 : vector<1x32xf32>
    %421 = arith.divf %419, %420 : vector<1x32xf32>
    %422 = arith.mulf %413, %364 : vector<1x32xf32>
    %423 = arith.mulf %407, %415 : vector<1x32xf32>
    %424 = arith.addf %422, %423 : vector<1x32xf32>
    %425 = math.tanh %424 : vector<1x32xf32>
    %426 = arith.mulf %421, %425 : vector<1x32xf32>
    %c6_75 = arith.constant 6 : index
    %c0_76 = arith.constant 0 : index
    %427 = vector.load %arg7[%c6_75, %c0_76] : memref<8x64xf32, #tpu.memory_space<vmem>>, vector<1x32xf32>
    tpu.vector_store %arg7[%c6_75, %c0_76], %398 {strides = array<i32>} : memref<8x64xf32, #tpu.memory_space<vmem>>, vector<1x32xf32>,
    %c1_77 = arith.constant 1 : index
    %c32_78 = arith.constant 32 : index
    %428 = vector.load %arg7[%c1_77, %c32_78] : memref<8x64xf32, #tpu.memory_space<vmem>>, vector<1x32xf32>
    tpu.vector_store %arg7[%c1_77, %c32_78], %426 {strides = array<i32>} : memref<8x64xf32, #tpu.memory_space<vmem>>, vector<1x32xf32>,
    %429 = tpu.concatenate %398, %426 in 1 : vector<1x32xf32>, vector<1x32xf32> -> vector<1x64xf32>
    %cst_79 = arith.constant dense<0.000000e+00> : vector<1x256xf32>
    %430 = tpu.matmul %429, %6, %cst_79 {dimension_numbers = #tpu.dot_dimension_numbers<[1], [0], [0], [1], [0, 0, 1, 1], [], []>} : vector<1x64xf32>, vector<64x256xf32>, vector<1x256xf32> -> vector<1x256xf32>
    %431 = vector.extract_strided_slice %5 {offsets = [7, 0], sizes = [1, 128], strides = [1, 1]} : vector<8x256xf32> to vector<1x128xf32>
    %432 = vector.extract_strided_slice %430 {offsets = [0, 0], sizes = [1, 128], strides = [1, 1]} : vector<1x256xf32> to vector<1x128xf32>
    %433 = arith.addf %431, %432 : vector<1x128xf32>
    %434 = vector.extract_strided_slice %433 {offsets = [0, 0], sizes = [1, 32], strides = [1, 1]} : vector<1x128xf32> to vector<1x32xf32>
    %435 = arith.negf %434 : vector<1x32xf32>
    %436 = math.exp %435 : vector<1x32xf32>
    %cst_80 = arith.constant 1.000000e+00 : f32
    %437 = vector.broadcast %cst_80 : f32 to vector<1x32xf32>
    %438 = arith.addf %437, %436 : vector<1x32xf32>
    %439 = arith.divf %437, %438 : vector<1x32xf32>
    %440 = vector.extract_strided_slice %433 {offsets = [0, 32], sizes = [1, 32], strides = [1, 1]} : vector<1x128xf32> to vector<1x32xf32>
    %441 = arith.negf %440 : vector<1x32xf32>
    %442 = math.exp %441 : vector<1x32xf32>
    %cst_81 = arith.constant 1.000000e+00 : f32
    %443 = vector.broadcast %cst_81 : f32 to vector<1x32xf32>
    %444 = arith.addf %443, %442 : vector<1x32xf32>
    %445 = arith.divf %443, %444 : vector<1x32xf32>
    %446 = vector.extract_strided_slice %433 {offsets = [0, 64], sizes = [1, 32], strides = [1, 1]} : vector<1x128xf32> to vector<1x32xf32>
    %447 = math.tanh %446 : vector<1x32xf32>
    %448 = vector.extract_strided_slice %433 {offsets = [0, 96], sizes = [1, 32], strides = [1, 1]} : vector<1x128xf32> to vector<1x32xf32>
    %449 = arith.negf %448 : vector<1x32xf32>
    %450 = math.exp %449 : vector<1x32xf32>
    %cst_82 = arith.constant 1.000000e+00 : f32
    %451 = vector.broadcast %cst_82 : f32 to vector<1x32xf32>
    %452 = arith.addf %451, %450 : vector<1x32xf32>
    %453 = arith.divf %451, %452 : vector<1x32xf32>
    %454 = arith.mulf %445, %396 : vector<1x32xf32>
    %455 = arith.mulf %439, %447 : vector<1x32xf32>
    %456 = arith.addf %454, %455 : vector<1x32xf32>
    %457 = math.tanh %456 : vector<1x32xf32>
    %458 = arith.mulf %453, %457 : vector<1x32xf32>
    %459 = vector.extract_strided_slice %5 {offsets = [0, 128], sizes = [1, 128], strides = [1, 1]} : vector<8x256xf32> to vector<1x128xf32>
    %460 = vector.extract_strided_slice %430 {offsets = [0, 128], sizes = [1, 128], strides = [1, 1]} : vector<1x256xf32> to vector<1x128xf32>
    %461 = arith.addf %459, %460 : vector<1x128xf32>
    %462 = vector.extract_strided_slice %461 {offsets = [0, 0], sizes = [1, 32], strides = [1, 1]} : vector<1x128xf32> to vector<1x32xf32>
    %463 = arith.negf %462 : vector<1x32xf32>
    %464 = math.exp %463 : vector<1x32xf32>
    %cst_83 = arith.constant 1.000000e+00 : f32
    %465 = vector.broadcast %cst_83 : f32 to vector<1x32xf32>
    %466 = arith.addf %465, %464 : vector<1x32xf32>
    %467 = arith.divf %465, %466 : vector<1x32xf32>
    %468 = vector.extract_strided_slice %461 {offsets = [0, 32], sizes = [1, 32], strides = [1, 1]} : vector<1x128xf32> to vector<1x32xf32>
    %469 = arith.negf %468 : vector<1x32xf32>
    %470 = math.exp %469 : vector<1x32xf32>
    %cst_84 = arith.constant 1.000000e+00 : f32
    %471 = vector.broadcast %cst_84 : f32 to vector<1x32xf32>
    %472 = arith.addf %471, %470 : vector<1x32xf32>
    %473 = arith.divf %471, %472 : vector<1x32xf32>
    %474 = vector.extract_strided_slice %461 {offsets = [0, 64], sizes = [1, 32], strides = [1, 1]} : vector<1x128xf32> to vector<1x32xf32>
    %475 = math.tanh %474 : vector<1x32xf32>
    %476 = vector.extract_strided_slice %461 {offsets = [0, 96], sizes = [1, 32], strides = [1, 1]} : vector<1x128xf32> to vector<1x32xf32>
    %477 = arith.negf %476 : vector<1x32xf32>
    %478 = math.exp %477 : vector<1x32xf32>
    %cst_85 = arith.constant 1.000000e+00 : f32
    %479 = vector.broadcast %cst_85 : f32 to vector<1x32xf32>
    %480 = arith.addf %479, %478 : vector<1x32xf32>
    %481 = arith.divf %479, %480 : vector<1x32xf32>
    %482 = arith.mulf %473, %424 : vector<1x32xf32>
    %483 = arith.mulf %467, %475 : vector<1x32xf32>
    %484 = arith.addf %482, %483 : vector<1x32xf32>
    %485 = math.tanh %484 : vector<1x32xf32>
    %486 = arith.mulf %481, %485 : vector<1x32xf32>
    %c7_86 = arith.constant 7 : index
    %c0_87 = arith.constant 0 : index
    %487 = vector.load %arg7[%c7_86, %c0_87] : memref<8x64xf32, #tpu.memory_space<vmem>>, vector<1x32xf32>
    tpu.vector_store %arg7[%c7_86, %c0_87], %458 {strides = array<i32>} : memref<8x64xf32, #tpu.memory_space<vmem>>, vector<1x32xf32>,
    %c0_88 = arith.constant 0 : index
    %c32_89 = arith.constant 32 : index
    %488 = vector.load %arg7[%c0_88, %c32_89] : memref<8x64xf32, #tpu.memory_space<vmem>>, vector<1x32xf32>
    tpu.vector_store %arg7[%c0_88, %c32_89], %486 {strides = array<i32>} : memref<8x64xf32, #tpu.memory_space<vmem>>, vector<1x32xf32>,
    %c0_90 = arith.constant 0 : index
    %c0_91 = arith.constant 0 : index
    %489 = vector.load %arg7[%c0_90, %c0_91] : memref<8x64xf32, #tpu.memory_space<vmem>>, vector<8x64xf32>
    %cst_92 = arith.constant 0.000000e+00 : f32
    %490 = vector.broadcast %cst_92 : f32 to vector<8x64xf32>
    %491 = arith.maximumf %489, %490 : vector<8x64xf32>
    %c0_93 = arith.constant 0 : index
    %c0_94 = arith.constant 0 : index
    %492 = vector.load %arg4[%c0_93, %c0_94] : memref<64x8xf32, #tpu.memory_space<vmem>>, vector<64x8xf32>
    %cst_95 = arith.constant dense<0.000000e+00> : vector<8x8xf32>
    %493 = tpu.matmul %491, %492, %cst_95 {dimension_numbers = #tpu.dot_dimension_numbers<[1], [0], [0], [1], [0, 0, 1, 1], [], []>} : vector<8x64xf32>, vector<64x8xf32>, vector<8x8xf32> -> vector<8x8xf32>
    %c0_96 = arith.constant 0 : index
    %c0_97 = arith.constant 0 : index
    %494 = vector.load %arg5[%c0_96, %c0_97] : memref<1x8xf32, #tpu.memory_space<vmem>>, vector<1x8xf32>
    %495 = vector.broadcast %494 : vector<1x8xf32> to vector<8x8xf32>
    %496 = arith.addf %493, %495 : vector<8x8xf32>
    %cst_98 = arith.constant dense<0xFF800000> : vector<8xf32>
    %497 = vector.multi_reduction <maximumf>, %496, %cst_98 [1] : vector<8x8xf32> to vector<8xf32>
    %498 = vector.shape_cast %497 : vector<8xf32> to vector<8x1xf32>
    %499 = vector.broadcast %498 : vector<8x1xf32> to vector<8x8xf32>
    %500 = arith.subf %496, %499 : vector<8x8xf32>
    %501 = math.exp %500 : vector<8x8xf32>
    %502 = vector.broadcast %498 : vector<8x1xf32> to vector<8x8xf32>
    %503 = arith.subf %496, %502 : vector<8x8xf32>
    %cst_99 = arith.constant dense<0.000000e+00> : vector<8xf32>
    %504 = vector.multi_reduction <add>, %501, %cst_99 [1] : vector<8x8xf32> to vector<8xf32>
    %505 = vector.shape_cast %504 : vector<8xf32> to vector<8x1xf32>
    %506 = math.log %505 : vector<8x1xf32>
    %507 = vector.broadcast %506 : vector<8x1xf32> to vector<8x8xf32>
    %508 = arith.subf %503, %507 : vector<8x8xf32>
    %c0_100 = arith.constant 0 : index
    %c0_101 = arith.constant 0 : index
    %509 = vector.load %arg6[%c0_100, %c0_101] : memref<8x8xf32, #tpu.memory_space<vmem>>, vector<8x8xf32>
    tpu.vector_store %arg6[%c0_100, %c0_101], %508 {strides = array<i32>} : memref<8x8xf32, #tpu.memory_space<vmem>>, vector<8x8xf32>,
    return
  }
}

</mosaic_0001>

<bundles_post_ra>
// kernel: tpu_custom_call.1
= control target key start
LH: loop header
LB: loop body
LE: loop exit
PB: predicated region body
PF: predicated region fallthrough
CT: control target
= control target key end

     0   :  { %11 = vsyncpa [#allocation4], 0  ;;  %s2180_s0 = inlined_call_operand.vmem [shape: f32[8,16], index: 0, kind: input, shape index: {}]   ;;  %s2181_s1 = inlined_call_operand.vmem [shape: f32[16,256], index: 1, kind: input, shape index: {}]   ;;  %s2182_s2 = inlined_call_operand.vmem [shape: f32[1,256], index: 2, kind: input, shape index: {}]   ;;  %s2183_s3 = inlined_call_operand.hbm [shape: f32[64,256], index: 3, kind: input, shape index: {}]   ;;  %s2184_s4 = inlined_call_operand.vmem [shape: f32[64,8], index: 4, kind: input, shape index: {}]   ;;  %s2185_s5 = inlined_call_operand.vmem [shape: f32[1,8], index: 5, kind: input, shape index: {}]   ;;  %s2186_s6 = inlined_call_operand.hbm [shape: f32[8,8], index: 6, kind: output, shape index: {}]  }
   0x1   :  { %12 = vsyncpa [#allocation5], 0  ;;  %s1718_s21 = smov [#allocation3]  }
   0x2   :  { %s24_s22 = sshll.u32 %s1718_s21, 4  ;;  %s25_s22 = int_to_ptr.vmem [resolvable:$true] %s24_s22 }
   0x3   :  { %s1682_s23 = scalar_lea.vmem %s25_s22, 2048  ;;  %p1687_p1 = scmp.lt.s32.totalorder %s25_s22, %s25_s22 }
   0x4   :  { %p1683_p0 = scmp.ne.s32.totalorder %s25_s22, %s1682_s23  ;;  %p1688_p2 = scmp.lt.s32.totalorder %s1682_s23, %s1682_s23 }
   0x6   :  { %p1689_p3 = por %p1688_p2, %p1687_p1 }
   0x8   :  { %p1690_p4 = pnand %p1689_p3, %p1683_p0 }
   0xa   :  { %1693 = shalt.err (!%p1690_p4)
}
   0xb   :  { %s1719_s24 = smov 256   ;;  %s1720_s25 = smov 16  }
   0xc   :  { %30 = dma.hbm_to_vmem [thread:$0]  %s2183_s3, 2048, %s25_s22, [#allocation4], %s1719_s24, %s1719_s24, %s1720_s25  }
   0xd   :  { %1714 = dma.done.wait [#allocation4], 2048  }
   0xe   :  { %1715 = vsyncadd [#allocation4], 4294965248  ;;  %v1721_v0 = vmov 0.0   ;;  %v1766_v1 = vld [vmem:[#allocation3 + $0x78] sm:$0xff]  ;;  %v1768_v2 = vld [vmem:[#allocation3 + $0x70] sm:$0xff]  ;;  %vm55_vm0 = vcmask 130048   ;;  %v45_v22 = vlaneseq }
   0xf   :  { %123 = vmatprep.mubr.f32.mxu0 %v1721_v0  ;;  %214 = vmatprep.mubr.f32.mxu1 %v1721_v0  ;;  %v1770_v3 = vld [vmem:[#allocation3 + $0x68] sm:$0xff]  ;;  %v1773_v4 = vld [vmem:[#allocation3 + $0x60] sm:$0xff]  ;;  %v1776_v5 = vld [vmem:[#allocation3 + $0x58] sm:$0xff]  ;;  %s1722_s13 = smov 64   ;;  %vm278_vm1 = vcmask 253952   ;;  %vm290_vm2 = vcmask 261120  }
  0x10   :  { %166 = vmatprep.subr.mxu1 %v1766_v1  ;;  %v1779_v6 = vld [vmem:[#allocation3 + $0x50] sm:$0xff]  ;;  %v1785_v8 = vld [vmem:[#allocation3 + $0x48] sm:$0xff]  ;;  %v40_v10 = vld [vmem:[%s2181_s1 + $0x8] sm:$0xff]  ;;  %v46_v23 = vshrl.u32 %v45_v22, 7  ;;  %vm146_vm3 = vcmask 523264   ;;  %vm432_vm4 = vcmask 254977  }
  0x11   :  { %167 = vmatpush1.msra.mxu1 %v1768_v2  ;;  %v42_v7 = vld [vmem:[%s2181_s1 + $0x18] sm:$0xff]  ;;  %v41_v9 = vld [vmem:[%s2181_s1 + $0x10] sm:$0xff]  ;;  %v1794_v11 = vld [vmem:[#allocation3 + $0x40] sm:$0xff]  ;;  %vm586_vm5 = vcmask 256002   ;;  %vm740_vm6 = vcmask 257027   ;;  %vm1724_vm7 = vmmov 0  }
  0x12   :  { %168 = vmatprep.subr.mxu1 %v1770_v3  ;;  %87 = vmatprep.subr.mxu0 %v42_v7  ;;  %v39_v12 = vld [vmem:[%s2181_s1] sm:$0xff]  ;;  %v1806_v15 = vld [vmem:[#allocation3 + $0x30] sm:$0xff]  ;;  %v1809_v16 = vld [vmem:[#allocation3 + $0x28] sm:$0xff]  ;;  %v47_v24 = vsub.s32 0, %v46_v23  ;;  %v51_v25 = vsub.s32 1, %v46_v23  ;;  %vm284_vm8 = vcmask 523527  }
  0x13   :  { %169 = vmatpush1.msra.mxu1 %v1773_v4  ;;  %88 = vmatpush1.msra.mxu0 %v41_v9  ;;  %v1800_v13 = vld [vmem:[#allocation3 + $0x38] sm:$0xff]  ;;  %v1812_v17 = vld [vmem:[#allocation3 + $0x20] sm:$0xff]  ;;  %v1820_v19 = vld [vmem:[#allocation3 + $0x10] sm:$0xff]  ;;  %vm438_vm9 = vcmask 522502   ;;  %vm1202_vm10 = vcmask 260102   ;;  %vm592_vm11 = vcmask 521477  }
  0x14   :  { %170 = vmatprep.subr.mxu1 %v1776_v5  ;;  %89 = vmatprep.subr.mxu0 %v40_v10  ;;  %v38_v14 = vld [vmem:[%s2180_s0] sm:$0xff]  ;;  %v1824_v20 = vld [vmem:[#allocation3 + $0x8] sm:$0xff]  ;;  %v1828_v21 = vld [vmem:[#allocation3] sm:$0xff]  ;;  %vm1048_vm12 = vcmask 259077   ;;  %vm746_vm13 = vcmask 520452   ;;  %vm894_vm14 = vcmask 258052  }
  0x15   :  { %171 = vmatpush1.msra.mxu1 %v1779_v6  ;;  %90 = vmatpush1.msra.mxu0 %v39_v12  ;;  %v1816_v18 = vld [vmem:[#allocation3 + $0x18] sm:$0xff]  ;;  %vm900_vm15 = vcmask 519427   ;;  %s1725_s30 = smov [#allocation6]  }
  0x16   :  { %172 = vmatprep.subr.mxu1 %v1785_v8  ;;  %1480 = vmatmul.mubr.msk.f32.vlgmr.msra.gmra.mxu0 %vm55_vm0, %v38_v14  ;;  %v43_v26 = vld [vmem:[%s2182_s2] sm:$0x3]  ;;  %s1723_s2 = smov 32   ;;  %vm1054_vm0 = vcmask 518402  }
  0x17   :  { %173 = vmatpush1.msra.mxu1 %v1794_v11  ;;  %311 = vmatprep.subr.mxu0 %v1766_v1  ;;  %v48_v28 = vrot.slane %v43_v26, %v47_v24  ;;  %v52_v29 = vrot.slane %v43_v26, %v51_v25 }
  0x18   :  { %174 = vmatprep.subr.mxu1 %v1800_v13  ;;  %312 = vmatpush1.msra.mxu0 %v1768_v2 }
  0x19   :  { %175 = vmatpush1.msra.mxu1 %v1806_v15  ;;  %313 = vmatprep.subr.mxu0 %v1770_v3 }
  0x1a   :  { %176 = vmatprep.subr.mxu1 %v1809_v16  ;;  %314 = vmatpush1.msra.mxu0 %v1773_v4 }
  0x1b   :  { %177 = vmatpush1.msra.mxu1 %v1812_v17  ;;  %315 = vmatprep.subr.mxu0 %v1776_v5 }
  0x1c   :  { %178 = vmatprep.subr.mxu1 %v1816_v18  ;;  %316 = vmatpush1.msra.mxu0 %v1779_v6 }
  0x1d   :  { %179 = vmatpush1.msra.mxu1 %v1820_v19  ;;  %317 = vmatprep.subr.mxu0 %v1785_v8 }
  0x1e   :  { %180 = vmatprep.subr.mxu1 %v1824_v20  ;;  %318 = vmatpush1.msra.mxu0 %v1794_v11 }
  0x1f   :  { %181 = vmatpush1.msra.mxu1 %v1828_v21  ;;  %319 = vmatprep.subr.mxu0 %v1800_v13 }
  0x20   :  { %215 = vmatmul.mubr.f32.vlgmr.msra.gmra.mxu1 %v1721_v0  ;;  %320 = vmatpush1.msra.mxu0 %v1806_v15 }
  0x21   :  { %359 = vmatprep.mubr.f32.mxu0 %v1721_v0  ;;  %321 = vmatprep.subr.mxu0 %v1809_v16 }
  0x22   :  { %465 = vmatprep.subr.mxu1 %v1766_v1  ;;  %322 = vmatpush1.msra.mxu0 %v1812_v17 }
  0x23   :  { %466 = vmatpush1.msra.mxu1 %v1768_v2  ;;  %323 = vmatprep.subr.mxu0 %v1816_v18 }
  0x24   :  { %467 = vmatprep.subr.mxu1 %v1770_v3  ;;  %324 = vmatpush1.msra.mxu0 %v1820_v19 }
  0x25   :  { %468 = vmatpush1.msra.mxu1 %v1773_v4  ;;  %325 = vmatprep.subr.mxu0 %v1824_v20 }
  0x26   :  { %469 = vmatprep.subr.mxu1 %v1776_v5  ;;  %326 = vmatpush1.msra.mxu0 %v1828_v21 }
  0x27   :  { %470 = vmatpush1.msra.mxu1 %v1779_v6  ;;  %513 = vmatprep.mubr.f32.mxu1 %v1721_v0 }
  0x28   :  { %471 = vmatprep.subr.mxu1 %v1785_v8  ;;  %619 = vmatprep.subr.mxu0 %v1766_v1 }
  0x29   :  { %472 = vmatpush1.msra.mxu1 %v1794_v11 }
  0x2a   :  { %473 = vmatprep.subr.mxu1 %v1800_v13 }
  0x2b   :  { %474 = vmatpush1.msra.mxu1 %v1806_v15 }
  0x2c   :  { %475 = vmatprep.subr.mxu1 %v1809_v16 }
  0x2d   :  { %476 = vmatpush1.msra.mxu1 %v1812_v17 }
  0x2e   :  { %477 = vmatprep.subr.mxu1 %v1816_v18 }
  0x2f   :  { %478 = vmatpush1.msra.mxu1 %v1820_v19 }
  0x30   :  { %479 = vmatprep.subr.mxu1 %v1824_v20 }
  0x31   :  { %480 = vmatpush1.msra.mxu1 %v1828_v21 }
  0x32   :  { %773 = vmatprep.subr.mxu1 %v1766_v1 }
  0xd6   :  { %v125_v27 = vpop.f32.mrf.mxu0 }
  0xd7   :  { %v1869_v33 = vadd.f32 %v125_v27, %v48_v28 }
  0xd8   :  { %v127_v30 = vpop.f32.mrf.mxu0 }
  0xd9   :  { %v1871_v34 = vadd.f32 %v127_v30, %v52_v29 }
  0xe0   :  { %v216_v31 = vpop.f32.mrf.mxu1 }
  0xe1   :  { %v221_v37 = vadd.f32 %v216_v31, %v1869_v33 }
  0xe2   :  { %v218_v32 = vpop.f32.mrf.mxu1 }
  0xe3   :  { %v247_v35 = vrot.slane %v218_v32, 1  ;;  %v1481_v41 = vmul.f32 -1.442695, %v221_v37 }
  0xe5   :  { %v249_v36 = vadd.f32 %v247_v35, %v1871_v34 }
  0xe7   :  { %1542 = vtanh.f32 %v249_v36  ;;  %v1482_v40 = vmul.f32 -1.442695, %v249_v36 }
  0xe8   :  { %1544 = vtanh.f32 %v221_v37 }
  0xe9   :  { %1546 = vpow2.f32 %v1482_v40 }
  0xea   :  { %1548 = vpow2.f32 %v1481_v41 }
  0xf4   :  { %v1543_v38 = vpop.eup %1542 }
  0xf5   :  { %259 = vrot.lane.b32.xlu0 %v1543_v38, %s1722_s13  ;;  %v1545_v39 = vpop.eup %1544 }
  0xf6   :  { %v1547_v42 = vpop.eup %1546 }
  0xf7   :  { %v253_v43 = vadd.f32 1.0, %v1547_v42  ;;  %v1549_v44 = vpop.eup %1548 }
  0xf8   :  { %v225_v45 = vadd.f32 1.0, %v1549_v44 }
  0xf9   :  { %231 = vrot.lane.b32.xlu0 %v1545_v39, %s1722_s13  ;;  %1550 = vrcp.f32 %v253_v43 }
  0xfa   :  { %1552 = vrcp.f32 %v225_v45 }
 0x106   :  { %v1551_v46 = vpop.eup %1550 }
 0x107   :  { %v1553_v49 = vpop.eup %1552  ;;  %v257_v52 = vmul.f32 0.0, %v1551_v46 }
 0x108   :  { %v229_v55 = vmul.f32 0.0, %v1553_v49 }
 0x167   :  { %v260_v47 = vpop.permute.xlu0 %259 }
 0x168   :  { %v262_v48 = vmul.f32 %v1551_v46, %v260_v47 }
 0x16a   :  { %264 = vrot.lane.b32.xlu1 %v262_v48, %s1723_s2 }
 0x16b   :  { %v232_v50 = vpop.permute.xlu0 %231 }
 0x16c   :  { %v234_v51 = vmul.f32 %v1553_v49, %v232_v50 }
 0x16e   :  { %236 = vrot.lane.b32.xlu1 %v234_v51, %s1723_s2 }
 0x1dc   :  { %v265_v53 = vpop.permute.xlu1 %264 }
 0x1dd   :  { %v1879_v54 = vadd.f32 %v265_v53, %v257_v52 }
 0x1df   :  { %1554 = vtanh.f32 %v1879_v54  ;;  %v409_v45 = vrot.slane %v1879_v54, 1 }
 0x1e0   :  { %v237_v56 = vpop.permute.xlu1 %236 }
 0x1e1   :  { %v1882_v57 = vadd.f32 %v237_v56, %v229_v55 }
 0x1e3   :  { %1556 = vtanh.f32 %v1882_v57  ;;  %v378_v43 = vrot.slane %v1882_v57, 7 }
 0x1ec   :  { %v1555_v58 = vpop.eup %1554 }
 0x1ed   :  { %270 = vrot.lane.b32.xlu0 %v1555_v58, %s1722_s13 }
 0x1f0   :  { %v1557_v59 = vpop.eup %1556 }
 0x1f1   :  { %242 = vrot.lane.b32.xlu1 %v1557_v59, %s1722_s13 }
 0x25f   :  { %v271_v60 = vpop.permute.xlu0 %270 }
 0x260   :  { %v1887_v61 = vmul.f32 %v1551_v46, %v271_v60 }
 0x262   :  { %v286_v62 = vrot.slane %v1887_v61, 7 }
 0x263   :  { %v243_v63 = vpop.permute.xlu1 %242 }
 0x264   :  { %v245_v7 = vmul.f32 %v1553_v49, %v243_v63  ;;  %287 = vrot.lane.b32.xlu1 %v286_v62, %s1722_s13 }
 0x266   :  { %275 = vrot.lane.b32.xlu0 %v245_v7, %s1723_s2 }
 0x2d6   :  { %v288_v9 = vpop.permute.xlu1 %287 }
 0x2d8   :  { %v276_v10 = vpop.permute.xlu0 %275 }
 0x2d9   :  { %279 = vst.msk [vmem:[#allocation2] sm:$0x1] %vm278_vm1, %v276_v10  ;;  %v291_v12 = vsel %vm290_vm2, %v276_v10, %v288_v9  ;;  %vm1208_vm1 = vcmask 517377  }
 0x2da   :  { %1483 = vmatmul.mubr.msk.f32.vlgmr.msra.gmra.mxu0 %vm146_vm3, %v291_v12 }
 0x2db   :  { %620 = vmatpush1.msra.mxu0 %v1768_v2  ;;  %667 = vmatprep.mubr.f32.mxu0 %v1721_v0 }
 0x2dc   :  { %621 = vmatprep.subr.mxu0 %v1770_v3 }
 0x2dd   :  { %622 = vmatpush1.msra.mxu0 %v1773_v4 }
 0x2de   :  { %623 = vmatprep.subr.mxu0 %v1776_v5 }
 0x2df   :  { %624 = vmatpush1.msra.mxu0 %v1779_v6 }
 0x2e0   :  { %625 = vmatprep.subr.mxu0 %v1785_v8 }
 0x2e1   :  { %626 = vmatpush1.msra.mxu0 %v1794_v11 }
 0x2e2   :  { %627 = vmatprep.subr.mxu0 %v1800_v13 }
 0x2e3   :  { %628 = vmatpush1.msra.mxu0 %v1806_v15 }
 0x2e4   :  { %629 = vmatprep.subr.mxu0 %v1809_v16 }
 0x2e5   :  { %630 = vmatpush1.msra.mxu0 %v1812_v17 }
 0x2e6   :  { %631 = vmatprep.subr.mxu0 %v1816_v18 }
 0x2e7   :  { %632 = vmatpush1.msra.mxu0 %v1820_v19 }
 0x2e8   :  { %633 = vmatprep.subr.mxu0 %v1824_v20 }
 0x2e9   :  { %634 = vmatpush1.msra.mxu0 %v1828_v21 }
 0x2ea   :  { %927 = vmatprep.subr.mxu0 %v1766_v1 }
 0x39a   :  { %v361_v14 = vpop.f32.mrf.mxu0 }
 0x39b   :  { %v367_v22 = vrot.slane %v361_v14, 7 }
 0x39c   :  { %v363_v23 = vpop.f32.mrf.mxu0 }
 0x39d   :  { %v369_v24 = vadd.f32 %v367_v22, %v1869_v33  ;;  %v398_v25 = vrot.slane %v363_v23, 2 }
 0x39f   :  { %1558 = vtanh.f32 %v369_v24  ;;  %v400_v26 = vadd.f32 %v398_v25, %v1871_v34  ;;  %v1484_v29 = vmul.f32 -1.442695, %v369_v24 }
 0x3a1   :  { %1560 = vtanh.f32 %v400_v26  ;;  %v1485_v30 = vmul.f32 -1.442695, %v400_v26 }
 0x3a2   :  { %1562 = vpow2.f32 %v1484_v29 }
 0x3a3   :  { %1564 = vpow2.f32 %v1485_v30 }
 0x3ac   :  { %v1559_v27 = vpop.eup %1558 }
 0x3ad   :  { %382 = vrot.lane.b32.xlu1 %v1559_v27, %s1722_s13 }
 0x3ae   :  { %v1561_v28 = vpop.eup %1560 }
 0x3af   :  { %413 = vrot.lane.b32.xlu0 %v1561_v28, %s1722_s13  ;;  %v1563_v31 = vpop.eup %1562 }
 0x3b0   :  { %v1565_v32 = vpop.eup %1564  ;;  %v373_v35 = vadd.f32 1.0, %v1563_v31 }
 0x3b1   :  { %v404_v36 = vadd.f32 1.0, %v1565_v32 }
 0x3b2   :  { %1566 = vrcp.f32 %v373_v35 }
 0x3b3   :  { %1568 = vrcp.f32 %v404_v36 }
 0x3bf   :  { %v1567_v37 = vpop.eup %1566 }
 0x3c0   :  { %v1569_v40 = vpop.eup %1568  ;;  %v380_v44 = vmul.f32 %v1567_v37, %v378_v43 }
 0x3c1   :  { %v411_v48 = vmul.f32 %v1569_v40, %v409_v45 }
 0x41f   :  { %v383_v38 = vpop.permute.xlu1 %382 }
 0x420   :  { %v385_v39 = vmul.f32 %v1567_v37, %v383_v38 }
 0x421   :  { %v414_v41 = vpop.permute.xlu0 %413 }
 0x422   :  { %387 = vrot.lane.b32.xlu1 %v385_v39, %s1723_s2  ;;  %v416_v42 = vmul.f32 %v1569_v40, %v414_v41 }
 0x424   :  { %418 = vrot.lane.b32.xlu0 %v416_v42, %s1723_s2 }
 0x494   :  { %v388_v46 = vpop.permute.xlu1 %387 }
 0x495   :  { %v1919_v47 = vadd.f32 %v388_v46, %v380_v44 }
 0x496   :  { %v419_v49 = vpop.permute.xlu0 %418 }
 0x497   :  { %1570 = vtanh.f32 %v1919_v47  ;;  %v1922_v50 = vadd.f32 %v419_v49, %v411_v48  ;;  %v532_v38 = vrot.slane %v1919_v47, 7 }
 0x499   :  { %1572 = vtanh.f32 %v1922_v50 }
 0x4a4   :  { %v1571_v51 = vpop.eup %1570 }
 0x4a5   :  { %393 = vrot.lane.b32.xlu1 %v1571_v51, %s1722_s13 }
 0x4a6   :  { %v1573_v52 = vpop.eup %1572 }
 0x4a7   :  { %424 = vrot.lane.b32.xlu0 %v1573_v52, %s1722_s13 }
 0x517   :  { %v394_v53 = vpop.permute.xlu1 %393 }
 0x518   :  { %v396_v55 = vmul.f32 %v1567_v37, %v394_v53 }
 0x519   :  { %v425_v54 = vpop.permute.xlu0 %424 }
 0x51a   :  { %429 = vrot.lane.b32.xlu0 %v396_v55, %s1723_s2  ;;  %v1928_v56 = vmul.f32 %v1569_v40, %v425_v54  ;;  %v563_v40 = vrot.slane %v1922_v50, 1 }
 0x51c   :  { %v440_v57 = vrot.slane %v1928_v56, 5 }
 0x51e   :  { %441 = vrot.lane.b32.xlu1 %v440_v57, %s1722_s13 }
 0x58c   :  { %v430_v58 = vpop.permute.xlu0 %429 }
 0x58d   :  { %433 = vst.msk [vmem:[#allocation2] sm:$0x2] %vm432_vm4, %v430_v58  ;;  %vm1359_vm4 = vcmask 516352  }
 0x590   :  { %v442_v59 = vpop.permute.xlu1 %441 }
 0x591   :  { %v444_v60 = vsel %vm290_vm2, %v430_v58, %v442_v59 }
 0x592   :  { %v446_v62 = vrot.slane %v444_v60, 1 }
 0x594   :  { %1486 = vmatmul.mubr.msk.f32.vlgmr.msra.gmra.mxu1 %vm146_vm3, %v446_v62 }
 0x595   :  { %774 = vmatpush1.msra.mxu1 %v1768_v2  ;;  %821 = vmatprep.mubr.f32.mxu1 %v1721_v0 }
 0x596   :  { %775 = vmatprep.subr.mxu1 %v1770_v3 }
 0x597   :  { %776 = vmatpush1.msra.mxu1 %v1773_v4 }
 0x598   :  { %777 = vmatprep.subr.mxu1 %v1776_v5 }
 0x599   :  { %778 = vmatpush1.msra.mxu1 %v1779_v6 }
 0x59a   :  { %779 = vmatprep.subr.mxu1 %v1785_v8 }
 0x59b   :  { %780 = vmatpush1.msra.mxu1 %v1794_v11 }
 0x59c   :  { %781 = vmatprep.subr.mxu1 %v1800_v13 }
 0x59d   :  { %782 = vmatpush1.msra.mxu1 %v1806_v15 }
 0x59e   :  { %783 = vmatprep.subr.mxu1 %v1809_v16 }
 0x59f   :  { %784 = vmatpush1.msra.mxu1 %v1812_v17 }
 0x5a0   :  { %785 = vmatprep.subr.mxu1 %v1816_v18 }
 0x5a1   :  { %786 = vmatpush1.msra.mxu1 %v1820_v19 }
 0x5a2   :  { %787 = vmatprep.subr.mxu1 %v1824_v20 }
 0x5a3   :  { %788 = vmatpush1.msra.mxu1 %v1828_v21 }
 0x5a4   :  { %1081 = vmatprep.subr.mxu1 %v1766_v1 }
 0x654   :  { %v515_v63 = vpop.f32.mrf.mxu1 }
 0x655   :  { %v521_v7 = vrot.slane %v515_v63, 6 }
 0x656   :  { %v517_v9 = vpop.f32.mrf.mxu1 }
 0x657   :  { %v523_v10 = vadd.f32 %v521_v7, %v1869_v33  ;;  %v552_v12 = vrot.slane %v517_v9, 3 }
 0x659   :  { %1574 = vtanh.f32 %v523_v10  ;;  %v554_v14 = vadd.f32 %v552_v12, %v1871_v34  ;;  %v1487_v24 = vmul.f32 -1.442695, %v523_v10 }
 0x65b   :  { %1576 = vtanh.f32 %v554_v14  ;;  %v1488_v25 = vmul.f32 -1.442695, %v554_v14 }
 0x65c   :  { %1578 = vpow2.f32 %v1487_v24 }
 0x65d   :  { %1580 = vpow2.f32 %v1488_v25 }
 0x666   :  { %v1575_v22 = vpop.eup %1574 }
 0x667   :  { %536 = vrot.lane.b32.xlu1 %v1575_v22, %s1722_s13 }
 0x668   :  { %v1577_v23 = vpop.eup %1576 }
 0x669   :  { %567 = vrot.lane.b32.xlu0 %v1577_v23, %s1722_s13  ;;  %v1579_v26 = vpop.eup %1578 }
 0x66a   :  { %v1581_v27 = vpop.eup %1580  ;;  %v527_v28 = vadd.f32 1.0, %v1579_v26 }
 0x66b   :  { %v558_v29 = vadd.f32 1.0, %v1581_v27 }
 0x66c   :  { %1582 = vrcp.f32 %v527_v28 }
 0x66d   :  { %1584 = vrcp.f32 %v558_v29 }
 0x679   :  { %v1583_v30 = vpop.eup %1582 }
 0x67a   :  { %v1585_v35 = vpop.eup %1584  ;;  %v534_v39 = vmul.f32 %v1583_v30, %v532_v38 }
 0x67b   :  { %v565_v43 = vmul.f32 %v1585_v35, %v563_v40 }
 0x6d9   :  { %v537_v31 = vpop.permute.xlu1 %536 }
 0x6da   :  { %v539_v32 = vmul.f32 %v1583_v30, %v537_v31 }
 0x6db   :  { %v568_v36 = vpop.permute.xlu0 %567 }
 0x6dc   :  { %541 = vrot.lane.b32.xlu1 %v539_v32, %s1723_s2  ;;  %v570_v37 = vmul.f32 %v1585_v35, %v568_v36 }
 0x6de   :  { %572 = vrot.lane.b32.xlu0 %v570_v37, %s1723_s2 }
 0x74e   :  { %v542_v41 = vpop.permute.xlu1 %541 }
 0x74f   :  { %v1959_v42 = vadd.f32 %v542_v41, %v534_v39 }
 0x750   :  { %v573_v44 = vpop.permute.xlu0 %572 }
 0x751   :  { %1586 = vtanh.f32 %v1959_v42  ;;  %v1962_v45 = vadd.f32 %v573_v44, %v565_v43  ;;  %v686_v31 = vrot.slane %v1959_v42, 7 }
 0x753   :  { %1588 = vtanh.f32 %v1962_v45 }
 0x75e   :  { %v1587_v46 = vpop.eup %1586 }
 0x75f   :  { %547 = vrot.lane.b32.xlu1 %v1587_v46, %s1722_s13 }
 0x760   :  { %v1589_v48 = vpop.eup %1588 }
 0x761   :  { %578 = vrot.lane.b32.xlu0 %v1589_v48, %s1722_s13 }
 0x7d1   :  { %v548_v47 = vpop.permute.xlu1 %547 }
 0x7d2   :  { %v550_v49 = vmul.f32 %v1583_v30, %v548_v47 }
 0x7d3   :  { %v579_v50 = vpop.permute.xlu0 %578 }
 0x7d4   :  { %583 = vrot.lane.b32.xlu0 %v550_v49, %s1723_s2  ;;  %v1968_v51 = vmul.f32 %v1585_v35, %v579_v50  ;;  %v717_v35 = vrot.slane %v1962_v45, 1 }
 0x7d6   :  { %v594_v52 = vrot.slane %v1968_v51, 3 }
 0x7d8   :  { %595 = vrot.lane.b32.xlu1 %v594_v52, %s1722_s13 }
 0x846   :  { %v584_v53 = vpop.permute.xlu0 %583 }
 0x847   :  { %587 = vst.msk [vmem:[#allocation2] sm:$0x4] %vm586_vm5, %v584_v53  ;;  %vm1451_vm5 = vcmask 64512  }
 0x84a   :  { %v596_v55 = vpop.permute.xlu1 %595 }
 0x84b   :  { %v598_v54 = vsel %vm290_vm2, %v584_v53, %v596_v55 }
 0x84c   :  { %v600_v57 = vrot.slane %v598_v54, 2 }
 0x84e   :  { %1489 = vmatmul.mubr.msk.f32.vlgmr.msra.gmra.mxu0 %vm146_vm3, %v600_v57 }
 0x84f   :  { %928 = vmatpush1.msra.mxu0 %v1768_v2  ;;  %975 = vmatprep.mubr.f32.mxu0 %v1721_v0 }
 0x850   :  { %929 = vmatprep.subr.mxu0 %v1770_v3 }
 0x851   :  { %930 = vmatpush1.msra.mxu0 %v1773_v4 }
 0x852   :  { %931 = vmatprep.subr.mxu0 %v1776_v5 }
 0x853   :  { %932 = vmatpush1.msra.mxu0 %v1779_v6 }
 0x854   :  { %933 = vmatprep.subr.mxu0 %v1785_v8 }
 0x855   :  { %934 = vmatpush1.msra.mxu0 %v1794_v11 }
 0x856   :  { %935 = vmatprep.subr.mxu0 %v1800_v13 }
 0x857   :  { %936 = vmatpush1.msra.mxu0 %v1806_v15 }
 0x858   :  { %937 = vmatprep.subr.mxu0 %v1809_v16 }
 0x859   :  { %938 = vmatpush1.msra.mxu0 %v1812_v17 }
 0x85a   :  { %939 = vmatprep.subr.mxu0 %v1816_v18 }
 0x85b   :  { %940 = vmatpush1.msra.mxu0 %v1820_v19 }
 0x85c   :  { %941 = vmatprep.subr.mxu0 %v1824_v20 }
 0x85d   :  { %942 = vmatpush1.msra.mxu0 %v1828_v21 }
 0x85e   :  { %1235 = vmatprep.subr.mxu0 %v1766_v1 }
 0x90e   :  { %v669_v58 = vpop.f32.mrf.mxu0 }
 0x90f   :  { %v675_v59 = vrot.slane %v669_v58, 5 }
 0x910   :  { %v671_v60 = vpop.f32.mrf.mxu0 }
 0x911   :  { %v677_v62 = vadd.f32 %v675_v59, %v1869_v33  ;;  %v706_v63 = vrot.slane %v671_v60, 4 }
 0x913   :  { %1590 = vtanh.f32 %v677_v62  ;;  %v708_v7 = vadd.f32 %v706_v63, %v1871_v34  ;;  %v1490_v12 = vmul.f32 -1.442695, %v677_v62 }
 0x915   :  { %1592 = vtanh.f32 %v708_v7  ;;  %v1491_v14 = vmul.f32 -1.442695, %v708_v7 }
 0x916   :  { %1594 = vpow2.f32 %v1490_v12 }
 0x917   :  { %1596 = vpow2.f32 %v1491_v14 }
 0x920   :  { %v1591_v9 = vpop.eup %1590 }
 0x921   :  { %690 = vrot.lane.b32.xlu1 %v1591_v9, %s1722_s13 }
 0x922   :  { %v1593_v10 = vpop.eup %1592 }
 0x923   :  { %721 = vrot.lane.b32.xlu0 %v1593_v10, %s1722_s13  ;;  %v1595_v1 = vpop.eup %1594 }
 0x924   :  { %v1597_v22 = vpop.eup %1596  ;;  %v681_v23 = vadd.f32 1.0, %v1595_v1 }
 0x925   :  { %v712_v24 = vadd.f32 1.0, %v1597_v22 }
 0x926   :  { %1598 = vrcp.f32 %v681_v23 }
 0x927   :  { %1600 = vrcp.f32 %v712_v24 }
 0x933   :  { %v1599_v25 = vpop.eup %1598 }
 0x934   :  { %v1601_v28 = vpop.eup %1600  ;;  %v688_v32 = vmul.f32 %v1599_v25, %v686_v31 }
 0x935   :  { %v719_v38 = vmul.f32 %v1601_v28, %v717_v35 }
 0x993   :  { %v691_v26 = vpop.permute.xlu1 %690 }
 0x994   :  { %v693_v27 = vmul.f32 %v1599_v25, %v691_v26 }
 0x995   :  { %v722_v29 = vpop.permute.xlu0 %721 }
 0x996   :  { %695 = vrot.lane.b32.xlu1 %v693_v27, %s1723_s2  ;;  %v724_v30 = vmul.f32 %v1601_v28, %v722_v29 }
 0x998   :  { %726 = vrot.lane.b32.xlu0 %v724_v30, %s1723_s2 }
 0xa08   :  { %v696_v36 = vpop.permute.xlu1 %695 }
 0xa09   :  { %v1999_v37 = vadd.f32 %v696_v36, %v688_v32 }
 0xa0a   :  { %v727_v39 = vpop.permute.xlu0 %726 }
 0xa0b   :  { %1602 = vtanh.f32 %v1999_v37  ;;  %v2002_v40 = vadd.f32 %v727_v39, %v719_v38  ;;  %v840_v27 = vrot.slane %v1999_v37, 7 }
 0xa0d   :  { %1604 = vtanh.f32 %v2002_v40  ;;  %v871_v29 = vrot.slane %v2002_v40, 1 }
 0xa18   :  { %v1603_v41 = vpop.eup %1602 }
 0xa19   :  { %701 = vrot.lane.b32.xlu1 %v1603_v41, %s1722_s13 }
 0xa1a   :  { %v1605_v43 = vpop.eup %1604 }
 0xa1b   :  { %732 = vrot.lane.b32.xlu0 %v1605_v43, %s1722_s13 }
 0xa8b   :  { %v702_v42 = vpop.permute.xlu1 %701 }
 0xa8c   :  { %v704_v44 = vmul.f32 %v1599_v25, %v702_v42 }
 0xa8d   :  { %v733_v45 = vpop.permute.xlu0 %732 }
 0xa8e   :  { %737 = vrot.lane.b32.xlu0 %v704_v44, %s1723_s2  ;;  %v2008_v46 = vmul.f32 %v1601_v28, %v733_v45 }
 0xa90   :  { %v748_v48 = vrot.slane %v2008_v46, 1 }
 0xa92   :  { %749 = vrot.lane.b32.xlu1 %v748_v48, %s1722_s13 }
 0xb00   :  { %v738_v47 = vpop.permute.xlu0 %737 }
 0xb01   :  { %741 = vst.msk [vmem:[#allocation2] sm:$0x8] %vm740_vm6, %v738_v47 }
 0xb04   :  { %v750_v49 = vpop.permute.xlu1 %749 }
 0xb05   :  { %v752_v50 = vsel %vm290_vm2, %v738_v47, %v750_v49 }
 0xb06   :  { %v754_v52 = vrot.slane %v752_v50, 3 }
 0xb08   :  { %1492 = vmatmul.mubr.msk.f32.vlgmr.msra.gmra.mxu1 %vm146_vm3, %v754_v52 }
 0xb09   :  { %1082 = vmatpush1.msra.mxu1 %v1768_v2  ;;  %1129 = vmatprep.mubr.f32.mxu1 %v1721_v0 }
 0xb0a   :  { %1083 = vmatprep.subr.mxu1 %v1770_v3 }
 0xb0b   :  { %1084 = vmatpush1.msra.mxu1 %v1773_v4 }
 0xb0c   :  { %1085 = vmatprep.subr.mxu1 %v1776_v5 }
 0xb0d   :  { %1086 = vmatpush1.msra.mxu1 %v1779_v6 }
 0xb0e   :  { %1087 = vmatprep.subr.mxu1 %v1785_v8 }
 0xb0f   :  { %1088 = vmatpush1.msra.mxu1 %v1794_v11 }
 0xb10   :  { %1089 = vmatprep.subr.mxu1 %v1800_v13 }
 0xb11   :  { %1090 = vmatpush1.msra.mxu1 %v1806_v15 }
 0xb12   :  { %1091 = vmatprep.subr.mxu1 %v1809_v16 }
 0xb13   :  { %1092 = vmatpush1.msra.mxu1 %v1812_v17 }
 0xb14   :  { %1093 = vmatprep.subr.mxu1 %v1816_v18 }
 0xb15   :  { %1094 = vmatpush1.msra.mxu1 %v1820_v19 }
 0xb16   :  { %1095 = vmatprep.subr.mxu1 %v1824_v20 }
 0xb17   :  { %1096 = vmatpush1.msra.mxu1 %v1828_v21 }
 0xb18   :  { %1515 = vmatprep.subr.mxu1 %v1721_v0 }
 0xbc8   :  { %v823_v53 = vpop.f32.mrf.mxu1 }
 0xbc9   :  { %v829_v55 = vrot.slane %v823_v53, 4 }
 0xbca   :  { %v825_v54 = vpop.f32.mrf.mxu1 }
 0xbcb   :  { %v831_v57 = vadd.f32 %v829_v55, %v1869_v33  ;;  %v860_v58 = vrot.slane %v825_v54, 5 }
 0xbcd   :  { %1606 = vtanh.f32 %v831_v57  ;;  %v862_v59 = vadd.f32 %v860_v58, %v1871_v34  ;;  %v1493_v63 = vmul.f32 -1.442695, %v831_v57 }
 0xbcf   :  { %1608 = vtanh.f32 %v862_v59  ;;  %v1494_v7 = vmul.f32 -1.442695, %v862_v59 }
 0xbd0   :  { %1610 = vpow2.f32 %v1493_v63 }
 0xbd1   :  { %1612 = vpow2.f32 %v1494_v7 }
 0xbda   :  { %v1607_v60 = vpop.eup %1606 }
 0xbdb   :  { %844 = vrot.lane.b32.xlu1 %v1607_v60, %s1722_s13 }
 0xbdc   :  { %v1609_v62 = vpop.eup %1608 }
 0xbdd   :  { %875 = vrot.lane.b32.xlu0 %v1609_v62, %s1722_s13  ;;  %v1611_v9 = vpop.eup %1610 }
 0xbde   :  { %v1613_v10 = vpop.eup %1612  ;;  %v835_v12 = vadd.f32 1.0, %v1611_v9 }
 0xbdf   :  { %v866_v14 = vadd.f32 1.0, %v1613_v10 }
 0xbe0   :  { %1614 = vrcp.f32 %v835_v12 }
 0xbe1   :  { %1616 = vrcp.f32 %v866_v14 }
 0xbed   :  { %v1615_v1 = vpop.eup %1614 }
 0xbee   :  { %v1617_v24 = vpop.eup %1616  ;;  %v842_v28 = vmul.f32 %v1615_v1, %v840_v27 }
 0xbef   :  { %v873_v32 = vmul.f32 %v1617_v24, %v871_v29 }
 0xc4d   :  { %v845_v22 = vpop.permute.xlu1 %844 }
 0xc4e   :  { %v847_v23 = vmul.f32 %v1615_v1, %v845_v22 }
 0xc4f   :  { %v876_v25 = vpop.permute.xlu0 %875 }
 0xc50   :  { %849 = vrot.lane.b32.xlu1 %v847_v23, %s1723_s2  ;;  %v878_v26 = vmul.f32 %v1617_v24, %v876_v25 }
 0xc52   :  { %880 = vrot.lane.b32.xlu0 %v878_v26, %s1723_s2 }
 0xcc2   :  { %v850_v30 = vpop.permute.xlu1 %849 }
 0xcc3   :  { %v2039_v31 = vadd.f32 %v850_v30, %v842_v28 }
 0xcc4   :  { %v881_v35 = vpop.permute.xlu0 %880 }
 0xcc5   :  { %1618 = vtanh.f32 %v2039_v31  ;;  %v2042_v36 = vadd.f32 %v881_v35, %v873_v32  ;;  %v994_v54 = vrot.slane %v2039_v31, 7 }
 0xcc7   :  { %1620 = vtanh.f32 %v2042_v36  ;;  %v1025_v58 = vrot.slane %v2042_v36, 1 }
 0xcd2   :  { %v1619_v38 = vpop.eup %1618 }
 0xcd3   :  { %855 = vrot.lane.b32.xlu1 %v1619_v38, %s1722_s13 }
 0xcd4   :  { %v1621_v39 = vpop.eup %1620 }
 0xcd5   :  { %886 = vrot.lane.b32.xlu0 %v1621_v39, %s1722_s13 }
 0xd45   :  { %v856_v37 = vpop.permute.xlu1 %855 }
 0xd46   :  { %v858_v41 = vmul.f32 %v1615_v1, %v856_v37 }
 0xd47   :  { %v887_v40 = vpop.permute.xlu0 %886 }
 0xd48   :  { %891 = vrot.lane.b32.xlu0 %v858_v41, %s1723_s2  ;;  %v2048_v43 = vmul.f32 %v1617_v24, %v887_v40 }
 0xd4a   :  { %v902_v42 = vrot.slane %v2048_v43, 7 }
 0xd4c   :  { %903 = vrot.lane.b32.xlu1 %v902_v42, %s1722_s13 }
 0xdba   :  { %v2052_v44 = vpop.permute.xlu0 %891 }
 0xdbe   :  { %v904_v45 = vpop.permute.xlu1 %903 }
 0xdbf   :  { %v906_v48 = vsel %vm290_vm2, %v2052_v44, %v904_v45 }
 0xdc0   :  { %v908_v47 = vrot.slane %v906_v48, 4 }
 0xdc2   :  { %1495 = vmatmul.mubr.msk.f32.vlgmr.msra.gmra.mxu0 %vm146_vm3, %v908_v47 }
 0xdc3   :  { %1236 = vmatpush1.msra.mxu0 %v1768_v2  ;;  %1283 = vmatprep.mubr.f32.mxu0 %v1721_v0 }
 0xdc4   :  { %1237 = vmatprep.subr.mxu0 %v1770_v3 }
 0xdc5   :  { %1238 = vmatpush1.msra.mxu0 %v1773_v4 }
 0xdc6   :  { %1239 = vmatprep.subr.mxu0 %v1776_v5 }
 0xdc7   :  { %1240 = vmatpush1.msra.mxu0 %v1779_v6 }
 0xdc8   :  { %1241 = vmatprep.subr.mxu0 %v1785_v8 }
 0xdc9   :  { %1242 = vmatpush1.msra.mxu0 %v1794_v11 }
 0xdca   :  { %1243 = vmatprep.subr.mxu0 %v1800_v13 }
 0xdcb   :  { %1244 = vmatpush1.msra.mxu0 %v1806_v15 }
 0xdcc   :  { %1245 = vmatprep.subr.mxu0 %v1809_v16 }
 0xdcd   :  { %1246 = vmatpush1.msra.mxu0 %v1812_v17 }
 0xdce   :  { %1247 = vmatprep.subr.mxu0 %v1816_v18 }
 0xdcf   :  { %1248 = vmatpush1.msra.mxu0 %v1820_v19 }
 0xdd0   :  { %1249 = vmatprep.subr.mxu0 %v1824_v20 }
 0xdd1   :  { %1250 = vmatpush1.msra.mxu0 %v1828_v21 }
 0xe82   :  { %v977_v2 = vpop.f32.mrf.mxu0 }
 0xe83   :  { %v983_v3 = vrot.slane %v977_v2, 3 }
 0xe84   :  { %v979_v4 = vpop.f32.mrf.mxu0 }
 0xe85   :  { %v985_v5 = vadd.f32 %v983_v3, %v1869_v33  ;;  %v1014_v6 = vrot.slane %v979_v4, 6 }
 0xe87   :  { %1622 = vtanh.f32 %v985_v5  ;;  %v1016_v8 = vadd.f32 %v1014_v6, %v1871_v34  ;;  %v1496_v15 = vmul.f32 -1.442695, %v985_v5 }
 0xe89   :  { %1624 = vtanh.f32 %v1016_v8  ;;  %v1497_v16 = vmul.f32 -1.442695, %v1016_v8 }
 0xe8a   :  { %1626 = vpow2.f32 %v1496_v15 }
 0xe8b   :  { %1628 = vpow2.f32 %v1497_v16 }
 0xe94   :  { %v1623_v11 = vpop.eup %1622 }
 0xe95   :  { %998 = vrot.lane.b32.xlu1 %v1623_v11, %s1722_s13 }
 0xe96   :  { %v1625_v13 = vpop.eup %1624 }
 0xe97   :  { %1029 = vrot.lane.b32.xlu0 %v1625_v13, %s1722_s13  ;;  %v1627_v17 = vpop.eup %1626 }
 0xe98   :  { %v1629_v18 = vpop.eup %1628  ;;  %v989_v19 = vadd.f32 1.0, %v1627_v17 }
 0xe99   :  { %v1020_v20 = vadd.f32 1.0, %v1629_v18 }
 0xe9a   :  { %1630 = vrcp.f32 %v989_v19 }
 0xe9b   :  { %1632 = vrcp.f32 %v1020_v20 }
 0xea7   :  { %v1631_v21 = vpop.eup %1630 }
 0xea8   :  { %v1633_v52 = vpop.eup %1632  ;;  %v996_v57 = vmul.f32 %v1631_v21, %v994_v54 }
 0xea9   :  { %v1027_v62 = vmul.f32 %v1633_v52, %v1025_v58 }
 0xf07   :  { %v999_v49 = vpop.permute.xlu1 %998 }
 0xf08   :  { %v1001_v50 = vmul.f32 %v1631_v21, %v999_v49 }
 0xf09   :  { %v1030_v53 = vpop.permute.xlu0 %1029 }
 0xf0a   :  { %1003 = vrot.lane.b32.xlu1 %v1001_v50, %s1723_s2  ;;  %v1032_v55 = vmul.f32 %v1633_v52, %v1030_v53 }
 0xf0c   :  { %1034 = vrot.lane.b32.xlu0 %v1032_v55, %s1723_s2 }
 0xf7c   :  { %v1004_v59 = vpop.permute.xlu1 %1003 }
 0xf7d   :  { %v1006_v60 = vadd.f32 %v1004_v59, %v996_v57 }
 0xf7e   :  { %v1035_v63 = vpop.permute.xlu0 %1034 }
 0xf7f   :  { %1634 = vtanh.f32 %v1006_v60  ;;  %v1037_v7 = vadd.f32 %v1035_v63, %v1027_v62  ;;  %v1148_v6 = vrot.slane %v1006_v60, 7 }
 0xf81   :  { %1636 = vtanh.f32 %v1037_v7  ;;  %v1179_v11 = vrot.slane %v1037_v7, 1 }
 0xf8c   :  { %v1635_v9 = vpop.eup %1634 }
 0xf8d   :  { %1009 = vrot.lane.b32.xlu1 %v1635_v9, %s1722_s13 }
 0xf8e   :  { %v1637_v10 = vpop.eup %1636 }
 0xf8f   :  { %1040 = vrot.lane.b32.xlu0 %v1637_v10, %s1722_s13 }
 0xfff   :  { %v1010_v12 = vpop.permute.xlu1 %1009 }
0x1000   :  { %v1012_v14 = vmul.f32 %v1631_v21, %v1010_v12 }
0x1001   :  { %v1041_v1 = vpop.permute.xlu0 %1040 }
0x1002   :  { %1045 = vrot.lane.b32.xlu0 %v1012_v14, %s1723_s2  ;;  %v2084_v22 = vmul.f32 %v1633_v52, %v1041_v1 }
0x1004   :  { %v1056_v23 = vrot.slane %v2084_v22, 5 }
0x1006   :  { %1057 = vrot.lane.b32.xlu1 %v1056_v23, %s1722_s13 }
0x1074   :  { %v2088_v24 = vpop.permute.xlu0 %1045 }
0x1078   :  { %v1058_v25 = vpop.permute.xlu1 %1057 }
0x1079   :  { %v1060_v26 = vsel %vm290_vm2, %v2088_v24, %v1058_v25 }
0x107a   :  { %v1062_v27 = vrot.slane %v1060_v26, 5 }
0x107c   :  { %1498 = vmatmul.mubr.msk.f32.vlgmr.msra.gmra.mxu1 %vm146_vm3, %v1062_v27 }
0x107d   :  { %1531 = vmatprep.mubr.msk.f32.mxu1 %vm1724_vm7, %v1721_v0 }
0x113c   :  { %v1131_v28 = vpop.f32.mrf.mxu1 }
0x113d   :  { %v1137_v29 = vrot.slane %v1131_v28, 2 }
0x113e   :  { %v1133_v30 = vpop.f32.mrf.mxu1 }
0x113f   :  { %v1139_v31 = vadd.f32 %v1137_v29, %v1869_v33  ;;  %v1168_v32 = vrot.slane %v1133_v30, 7 }
0x1141   :  { %1638 = vtanh.f32 %v1139_v31  ;;  %v1170_v35 = vadd.f32 %v1168_v32, %v1871_v34  ;;  %v1499_v39 = vmul.f32 -1.442695, %v1139_v31 }
0x1143   :  { %1640 = vtanh.f32 %v1170_v35  ;;  %v1500_v37 = vmul.f32 -1.442695, %v1170_v35 }
0x1144   :  { %1642 = vpow2.f32 %v1499_v39 }
0x1145   :  { %1644 = vpow2.f32 %v1500_v37 }
0x114e   :  { %v1639_v36 = vpop.eup %1638 }
0x114f   :  { %1152 = vrot.lane.b32.xlu1 %v1639_v36, %s1722_s13 }
0x1150   :  { %v1641_v38 = vpop.eup %1640 }
0x1151   :  { %1183 = vrot.lane.b32.xlu0 %v1641_v38, %s1722_s13  ;;  %v1643_v41 = vpop.eup %1642 }
0x1152   :  { %v1645_v40 = vpop.eup %1644  ;;  %v1143_v42 = vadd.f32 1.0, %v1643_v41 }
0x1153   :  { %v1174_v45 = vadd.f32 1.0, %v1645_v40 }
0x1154   :  { %1646 = vrcp.f32 %v1143_v42 }
0x1155   :  { %1648 = vrcp.f32 %v1174_v45  ;;  %v1370_v45 = vld [vmem:[%s2184_s4 + $0x38] sm:$0xff] }
0x1156   :  { %1516 = vmatpush3.msra.mxu1 %v1370_v45 }
0x1157   :  { %1517 = vmatprep.subr.mxu1 %v1721_v0 }
0x1161   :  { %v1647_v48 = vpop.eup %1646 }
0x1162   :  { %v1649_v3 = vpop.eup %1648  ;;  %v1150_v8 = vmul.f32 %v1647_v48, %v1148_v6 }
0x1163   :  { %v1181_v16 = vmul.f32 %v1649_v3, %v1179_v11 }
0x11c1   :  { %v1153_v47 = vpop.permute.xlu1 %1152 }
0x11c2   :  { %v1155_v2 = vmul.f32 %v1647_v48, %v1153_v47  ;;  %v1368_v47 = vld [vmem:[%s2184_s4 + $0x28] sm:$0xff] }
0x11c3   :  { %v1184_v4 = vpop.permute.xlu0 %1183 }
0x11c4   :  { %1157 = vrot.lane.b32.xlu1 %v1155_v2, %s1723_s2  ;;  %v1186_v5 = vmul.f32 %v1649_v3, %v1184_v4 }
0x11c6   :  { %1188 = vrot.lane.b32.xlu0 %v1186_v5, %s1723_s2 }
0x1236   :  { %v1158_v13 = vpop.permute.xlu1 %1157 }
0x1237   :  { %v1160_v15 = vadd.f32 %v1158_v13, %v1150_v8 }
0x1238   :  { %v1189_v17 = vpop.permute.xlu0 %1188 }
0x1239   :  { %1650 = vtanh.f32 %v1160_v15  ;;  %v1191_v18 = vadd.f32 %v1189_v17, %v1181_v16  ;;  %v1302_v31 = vrot.slane %v1160_v15, 7 }
0x123b   :  { %1652 = vtanh.f32 %v1191_v18  ;;  %v1330_v32 = vrot.slane %v1191_v18, 1 }
0x1246   :  { %v1651_v19 = vpop.eup %1650 }
0x1247   :  { %1163 = vrot.lane.b32.xlu1 %v1651_v19, %s1722_s13 }
0x1248   :  { %v1653_v20 = vpop.eup %1652 }
0x1249   :  { %1194 = vrot.lane.b32.xlu0 %v1653_v20, %s1722_s13 }
0x12b9   :  { %v1164_v21 = vpop.permute.xlu1 %1163 }
0x12ba   :  { %v1166_v49 = vmul.f32 %v1647_v48, %v1164_v21  ;;  %v1369_v48 = vld [vmem:[%s2184_s4 + $0x30] sm:$0xff] }
0x12bb   :  { %v1195_v50 = vpop.permute.xlu0 %1194  ;;  %1518 = vmatpush3.msra.mxu1 %v1369_v48 }
0x12bc   :  { %1199 = vrot.lane.b32.xlu0 %v1166_v49, %s1723_s2  ;;  %v2102_v52 = vmul.f32 %v1649_v3, %v1195_v50  ;;  %1519 = vmatprep.subr.mxu1 %v1721_v0 }
0x12bd   :  { %1520 = vmatpush3.msra.mxu1 %v1368_v47 }
0x12be   :  { %v1210_v53 = vrot.slane %v2102_v52, 3  ;;  %1521 = vmatprep.subr.mxu1 %v1721_v0 }
0x12c0   :  { %1211 = vrot.lane.b32.xlu1 %v1210_v53, %s1722_s13 }
0x132e   :  { %v2106_v55 = vpop.permute.xlu0 %1199 }
0x1332   :  { %v1212_v54 = vpop.permute.xlu1 %1211 }
0x1333   :  { %v1214_v57 = vsel %vm290_vm2, %v2106_v55, %v1212_v54  ;;  %vm1353_vm2 = vcmask 261127  }
0x1334   :  { %v1216_v58 = vrot.slane %v1214_v57, 6 }
0x1336   :  { %1501 = vmatmul.mubr.msk.f32.vlgmr.msra.gmra.mxu0 %vm146_vm3, %v1216_v58 }
0x13f6   :  { %v1285_v59 = vpop.f32.mrf.mxu0 }
0x13f7   :  { %v1291_v60 = vrot.slane %v1285_v59, 1 }
0x13f8   :  { %v1287_v62 = vpop.f32.mrf.mxu0 }
0x13f9   :  { %v1293_v63 = vadd.f32 %v1291_v60, %v1869_v33  ;;  %v1321_v7 = vadd.f32 %v1287_v62, %v1871_v34 }
0x13fb   :  { %1654 = vtanh.f32 %v1293_v63  ;;  %v1502_v12 = vmul.f32 -1.442695, %v1293_v63  ;;  %v1503_v14 = vmul.f32 -1.442695, %v1321_v7 }
0x13fc   :  { %1656 = vtanh.f32 %v1321_v7 }
0x13fd   :  { %1658 = vpow2.f32 %v1502_v12 }
0x13fe   :  { %1660 = vpow2.f32 %v1503_v14 }
0x1408   :  { %v1655_v9 = vpop.eup %1654 }
0x1409   :  { %v1657_v10 = vpop.eup %1656  ;;  %1306 = vrot.lane.b32.xlu0 %v1655_v9, %s1722_s13 }
0x140a   :  { %1334 = vrot.lane.b32.xlu1 %v1657_v10, %s1722_s13  ;;  %v1659_v1 = vpop.eup %1658 }
0x140b   :  { %v1661_v23 = vpop.eup %1660  ;;  %v1297_v25 = vadd.f32 1.0, %v1659_v1 }
0x140c   :  { %v1325_v26 = vadd.f32 1.0, %v1661_v23 }
0x140d   :  { %1662 = vrcp.f32 %v1297_v25 }
0x140e   :  { %1664 = vrcp.f32 %v1325_v26 }
0x141a   :  { %v1663_v33 = vpop.eup %1662 }
0x141b   :  { %v1665_v27 = vpop.eup %1664  ;;  %v1304_v35 = vmul.f32 %v1663_v33, %v1302_v31 }
0x141c   :  { %v1332_v38 = vmul.f32 %v1665_v27, %v1330_v32 }
0x147b   :  { %v1307_v34 = vpop.permute.xlu0 %1306 }
0x147c   :  { %v1309_v28 = vmul.f32 %v1663_v33, %v1307_v34  ;;  %v1335_v29 = vpop.permute.xlu1 %1334 }
0x147d   :  { %v1337_v30 = vmul.f32 %v1665_v27, %v1335_v29 }
0x147e   :  { %1311 = vrot.lane.b32.xlu0 %v1309_v28, %s1723_s2 }
0x147f   :  { %1339 = vrot.lane.b32.xlu1 %v1337_v30, %s1723_s2 }
0x14f0   :  { %v1312_v36 = vpop.permute.xlu0 %1311 }
0x14f1   :  { %v1314_v39 = vadd.f32 %v1312_v36, %v1304_v35  ;;  %v1340_v37 = vpop.permute.xlu1 %1339 }
0x14f2   :  { %v1342_v41 = vadd.f32 %v1340_v37, %v1332_v38 }
0x14f3   :  { %1666 = vtanh.f32 %v1314_v39 }
0x14f4   :  { %1668 = vtanh.f32 %v1342_v41 }
0x1500   :  { %v1667_v40 = vpop.eup %1666 }
0x1501   :  { %v1669_v42 = vpop.eup %1668  ;;  %1317 = vrot.lane.b32.xlu0 %v1667_v40, %s1722_s13 }
0x1502   :  { %1345 = vrot.lane.b32.xlu1 %v1669_v42, %s1722_s13 }
0x1505   :  { %281 = vrot.lane.b32.xlu0 %v1887_v61, %s1722_s13  ;;  %v1367_v61 = vld [vmem:[%s2184_s4 + $0x20] sm:$0xff] }
0x1506   :  { %435 = vrot.lane.b32.xlu1 %v1928_v56, %s1722_s13  ;;  %v1366_v56 = vld [vmem:[%s2184_s4 + $0x18] sm:$0xff]  ;;  %1522 = vmatpush3.msra.mxu1 %v1367_v61 }
0x1507   :  { %1523 = vmatprep.subr.mxu1 %v1721_v0 }
0x1508   :  { %1524 = vmatpush3.msra.mxu1 %v1366_v56 }
0x1509   :  { %589 = vrot.lane.b32.xlu0 %v1968_v51, %s1722_s13  ;;  %v1365_v51 = vld [vmem:[%s2184_s4 + $0x10] sm:$0xff]  ;;  %1525 = vmatprep.subr.mxu1 %v1721_v0 }
0x150a   :  { %743 = vrot.lane.b32.xlu1 %v2008_v46, %s1722_s13  ;;  %v1364_v46 = vld [vmem:[%s2184_s4 + $0x8] sm:$0xff]  ;;  %1526 = vmatpush3.msra.mxu1 %v1365_v51 }
0x150b   :  { %1527 = vmatprep.subr.mxu1 %v1721_v0 }
0x150c   :  { %1528 = vmatpush3.msra.mxu1 %v1364_v46 }
0x150d   :  { %897 = vrot.lane.b32.xlu0 %v2048_v43, %s1722_s13  ;;  %v1363_v43 = vld [vmem:[%s2184_s4] sm:$0xff]  ;;  %1529 = vmatprep.subr.mxu1 %v1721_v0 }
0x150e   :  { %1051 = vrot.lane.b32.xlu1 %v2084_v22, %s1722_s13  ;;  %1530 = vmatpush3.msra.mxu1 %v1363_v43 }
0x1511   :  { %1205 = vrot.lane.b32.xlu0 %v2102_v52, %s1722_s13 }
0x1573   :  { %v1318_v22 = vpop.permute.xlu0 %1317 }
0x1574   :  { %v1320_v2 = vmul.f32 %v1663_v33, %v1318_v22  ;;  %v1346_v3 = vpop.permute.xlu1 %1345 }
0x1575   :  { %v1348_v4 = vmul.f32 %v1665_v27, %v1346_v3 }
0x1576   :  { %1350 = vrot.lane.b32.xlu1 %v1320_v2, %s1723_s2 }
0x1577   :  { %1356 = vrot.lane.b32.xlu0 %v1348_v4, %s1722_s13  ;;  %v282_v5 = vpop.permute.xlu0 %281 }
0x1578   :  { %285 = vst.msk [vmem:[#allocation2] sm:$0x80] %vm284_vm8, %v282_v5  ;;  %v436_v6 = vpop.permute.xlu1 %435 }
0x1579   :  { %439 = vst.msk [vmem:[#allocation2] sm:$0x40] %vm438_vm9, %v436_v6 }
0x157a   :  { %1203 = vst.msk [vmem:[#allocation2] sm:$0x40] %vm1202_vm10, %v2106_v55 }
0x157b   :  { %v590_v0 = vpop.permute.xlu0 %589 }
0x157c   :  { %593 = vst.msk [vmem:[#allocation2] sm:$0x20] %vm592_vm11, %v590_v0  ;;  %v744_v8 = vpop.permute.xlu1 %743 }
0x157d   :  { %1049 = vst.msk [vmem:[#allocation2] sm:$0x20] %vm1048_vm12, %v2088_v24 }
0x157e   :  { %747 = vst.msk [vmem:[#allocation2] sm:$0x10] %vm746_vm13, %v744_v8 }
0x157f   :  { %895 = vst.msk [vmem:[#allocation2] sm:$0x10] %vm894_vm14, %v2052_v44  ;;  %v898_v11 = vpop.permute.xlu0 %897  ;;  %v1504_v44 = vld [vmem:[%s2185_s5] ss:$0 sm:$0xff]  ;;  %s1471_s5 = sshll.u32 %s1725_s30, 4  ;;  %s1472_s5 = int_to_ptr.vmem [resolvable:$true] %s1471_s5 }
0x1580   :  { %901 = vst.msk [vmem:[#allocation2] sm:$0x8] %vm900_vm15, %v898_v11  ;;  %v1052_v13 = vpop.permute.xlu1 %1051  ;;  %s1694_s7 = scalar_lea.vmem %s1472_s5, 128  ;;  %p1699_p6 = scmp.lt.s32.totalorder %s1472_s5, %s1472_s5 }
0x1581   :  { %1055 = vst.msk [vmem:[#allocation2] sm:$0x4] %vm1054_vm0, %v1052_v13  ;;  %p1695_p5 = scmp.ne.s32.totalorder %s1472_s5, %s1694_s7  ;;  %p1700_p7 = scmp.lt.s32.totalorder %s1694_s7, %s1694_s7 }
0x1583   :  { %v1206_v15 = vpop.permute.xlu0 %1205  ;;  %p1701_p8 = por %p1700_p7, %p1699_p6 }
0x1584   :  { %1209 = vst.msk [vmem:[#allocation2] sm:$0x2] %vm1208_vm1, %v1206_v15 }
0x1585   :  { %p1702_p9 = pnand %p1701_p8, %p1695_p5 }
0x15e8   :  { %v1351_v16 = vpop.permute.xlu1 %1350 }
0x15e9   :  { %v1357_v17 = vpop.permute.xlu0 %1356  ;;  %1354 = vst.msk [vmem:[#allocation2] sm:$0x80] %vm1353_vm2, %v1351_v16 }
0x15ea   :  { %1360 = vst.msk [vmem:[#allocation2] sm:$0x1] %vm1359_vm4, %v1357_v17 }
0x15f1   :  { %v1361_v18 = vld [vmem:[#allocation2] sm:$0xff] }
0x15f2   :  { %v1362_v24 = vmax.f32 %v1361_v18, 0.0 }
0x15f4   :  { %1532 = vmatmul.mubr.msk.f32.vlgmr.msra.gmra.mxu1 %vm146_vm3, %v1362_v24 }
0x16b4   :  { %v1447_v19 = vpop.f32.mrf.mxu1 }
0x16b5   :  { %v1448_v20 = vadd.f32 %v1504_v44, %v1447_v19 }
0x16b6   :  { %v1533_v21 = vpop.f32.mrf.mxu1 }
0x16b7   :  { %v1452_v49 = vsel %vm1451_vm5, %v1448_v20, -inf }
0x16b8   :  { %1453 = vmax.xlane.f32.xlu1 %v1452_v49 }
0x1741   :  { %v1454_v50 = vpop.xlane.xlu1 %1453 }
0x1742   :  { %v1455_v52 = vsub.f32 %v1448_v20, %v1454_v50 }
0x1744   :  { %v1456_v53 = vmul.f32 1.442695, %v1455_v52 }
0x1746   :  { %1670 = vpow2.f32 %v1456_v53 }
0x1753   :  { %v1671_v55 = vpop.eup %1670 }
0x1754   :  { %v1458_v54 = vsel %vm1451_vm5, %v1671_v55, 0.0 }
0x1755   :  { %1459 = vadd.xlane.f32.xlu0 %v1458_v54 }
0x17de   :  { %v1460_v57 = vpop.xlane.xlu0 %1459 }
0x17df   :  { %1672 = vlog2.f32 %v1460_v57 }
0x17ec   :  { %v1673_v58 = vpop.eup %1672 }
0x17ed   :  { %v1462_v59 = vmul.f32 0.6931472, %v1673_v58 }
0x17ef   :  { %v1463_v60 = vsub.f32 %v1455_v52, %v1462_v59 }
0x17f1   :  { %1464 = vst.msk [vmem:[#allocation6] sm:$0xff] %vm1451_vm5, %v1463_v60 }
0x17f2   :  { %1705 = shalt.err (!%p1702_p9)
}
0x17f3   :  { %1474 = dma.vmem_to_hbm [thread:$0]  %s1472_s5, 128, %s2186_s6, [#allocation5]  }
0x17f4   :  { %1716 = dma.done.wait [#allocation5], 128  }
0x17f5   :  { %1717 = vsyncadd [#allocation5], 4294967168 }
0x17f6   :  { %1478 = vsyncpa [#allocation4], 1 }
0x17f7   :  { %1479 = vsyncpa [#allocation5], 1 }

</bundles_post_ra>
